<compile_context>
chip_gen: v5e
topology: v5e:2x2
jax: 0.10.0
libtpu: 0.0.40
codegen_flags: <defaults>
</compile_context>

<pallas_src>
import functools
import math

import jax
import jax.numpy as jnp
from jax.experimental import pallas as pl
from jax.experimental.pallas import tpu as pltpu

# ----------------------------- config (small, synthetic) -----------------------------
BATCH = 2
SEQ = 8
HIDDEN = 128          # stands in for transformer_hidden_size=768 (kept lane-aligned)
NUM_HEADS = 4
HEAD_DIM = HIDDEN // NUM_HEADS
FFN = 256
VOCAB = 64
NUM_LAYERS = 2
CLS_HIDDEN = 50       # self.hidden_size = 50 in the module
CLS_HIDDEN_PAD = 128  # lane-padded classifier hidden (padding is exact: zeros)
NUM_CLASSES = 1       # self.num_classes = 1 in the module
OUT_PAD = 128         # lane-padded logits (sliced back to 1 outside the kernel)
LN_EPS = 1e-12
NUM_BATCH_SHARDS = 1  # 1 on v5e/v6e (single TC); 2 on v7x (one batch shard per TC)
VEC_ROWS = 8          # rows of the packed parameter slabs


def _layer_norm(x, gamma, beta, eps=LN_EPS):
    mu = jnp.mean(x, axis=-1, keepdims=True)
    var = jnp.mean((x - mu) ** 2, axis=-1, keepdims=True)
    return (x - mu) * jax.lax.rsqrt(var + eps) * gamma + beta


# ----------------------------- fused Pallas kernel -----------------------------
def fused_forward_kernel(onehot_ref, mask_ref, tok_ref, pos_ref, cvec_ref,
                         wqkv_ref, wo_ref, w1_ref, w2_ref, lvec_ref,
                         cw1_ref, cw2_ref, out_ref, act_ref, *, num_heads):
    """grid = (batch_shard, layer). One grid step = one encoder layer for one shard.

    Layer 0 additionally computes the embedding; the last layer additionally runs the
    classifier head.  The folded (B*S, D) residual stream stays resident in VMEM scratch.
    """
    l = pl.program_id(1)
    n_layers = pl.num_programs(1)

    cvec = cvec_ref[...]                                           # (8, 128) f32 const slab

    # ---- layer 0 only: embedding (one-hot @ tok_emb on the MXU) + embedding LayerNorm
    @pl.when(l == 0)
    def _embed():
        emb = jnp.dot(onehot_ref[...], tok_ref[...],
                      preferred_element_type=jnp.float32)          # (B*S, D) f32
        emb = emb + pos_ref[...]                                   # pre-tiled positions
        act_ref[...] = _layer_norm(emb, cvec[0:1, :], cvec[1:2, :])

    x = act_ref[...]                                               # (B*S, D) f32
    bs, d = x.shape
    hd = d // num_heads
    ffn = w1_ref.shape[-1]
    scale = 1.0 / math.sqrt(hd)

    # Packed per-layer vectors: ONE DMA instead of eight tiny padded tiles.
    lvec = lvec_ref[...]                                           # (8, 3D) f32
    bqkv = lvec[0:1, :]
    bo = lvec[1:2, :d]
    b1 = lvec[2:3, :ffn]
    b2 = lvec[3:4, :d]
    ln1g, ln1b = lvec[4:5, :d], lvec[5:6, :d]
    ln2g, ln2b = lvec[6:7, :d], lvec[7:8, :d]

    # Fused QKV projection: one (B*S, D) @ (D, 3D) MXU matmul + one bias add.
    xb = x.astype(jnp.bfloat16)
    qkv = jnp.dot(xb, wqkv_ref[...],
                  preferred_element_type=jnp.float32) + bqkv       # (B*S, 3D) f32

    # Head split with ONE packed-bf16 shuffle: transpose once, then a layout-preserving
    # sublane split + leading-axis slices (no 32-lane lane-slices / concatenates).
    qkv_t = qkv.astype(jnp.bfloat16).T                             # (3D, B*S) bf16
    g = qkv_t.reshape(3 * num_heads, hd, bs)                       # (3H, hd, B*S)
    q_t = g[0:num_heads]                                           # (H, hd, B*S)
    k_t = g[num_heads:2 * num_heads]
    v_t = g[2 * num_heads:]
    q = jnp.transpose(q_t, (0, 2, 1))                              # (H, B*S, hd)

    # Scores for all heads in one batched MXU call over (B*S x B*S) tiles; key-padding and
    # cross-batch pairs are removed by the precomputed additive mask.
    s = jax.lax.dot_general(q, k_t, (((2,), (1,)), ((0,), (0,))),
                            preferred_element_type=jnp.float32) * scale   # (H, B*S, B*S)
    s = s + mask_ref[...][None]

    m = jnp.max(s, axis=-1, keepdims=True)                         # softmax in f32 (exact)
    p = jnp.exp(s - m)
    p = p / jnp.sum(p, axis=-1, keepdims=True)

    ctx = jax.lax.dot_general(p.astype(jnp.bfloat16), v_t,
                              (((2,), (2,)), ((0,), (0,))),
                              preferred_element_type=jnp.float32)  # (H, B*S, hd)

    # Output projection: one head-batched dot + a cheap 4-wide leading-axis reduce.
    wo3 = wo_ref[...].reshape(num_heads, hd, d)                    # (H, hd, D) bf16
    parts = jax.lax.dot_general(ctx.astype(jnp.bfloat16), wo3,
                                (((2,), (1,)), ((0,), (0,))),
                                preferred_element_type=jnp.float32)  # (H, B*S, D)
    attn = jnp.sum(parts, axis=0) + bo                             # (B*S, D)

    h1 = _layer_norm(x + attn, ln1g, ln1b)                         # residual + LN in f32

    f = jnp.dot(h1.astype(jnp.bfloat16), w1_ref[...],
                preferred_element_type=jnp.float32) + b1
    # TODO(synk): HF BERT uses erf-GELU; tanh-GELU kept here for guaranteed EUP lowering.
    f = jax.nn.gelu(f, approximate=True)
    f = jnp.dot(f.astype(jnp.bfloat16), w2_ref[...],
                preferred_element_type=jnp.float32) + b2
    h2 = _layer_norm(h1 + f, ln2g, ln2b)

    act_ref[...] = h2

    # ---- last layer only: classifier head (nn.Dropout(0.3) is identity at inference).
    # Computed on all B*S rows with lane-dense 128-wide matmuls / unmasked stores; the
    # CLS (position 0) rows and the single real logit are selected outside the kernel.
    @pl.when(l == n_layers - 1)
    def _classify():
        hb = h2.astype(jnp.bfloat16)
        hc = jnp.dot(hb, cw1_ref[...],
                     preferred_element_type=jnp.float32) + cvec[2:3, :]
        hc = jnp.maximum(hc, 0.0)                                  # ReLU
        out_ref[...] = jnp.dot(hc.astype(jnp.bfloat16), cw2_ref[...],
                               preferred_element_type=jnp.float32) + cvec[3:4, :]


# ----------------------------- pallas_call wrapper -----------------------------
def _const_spec(shape):
    """Whole-array block, same block for every grid point (stays resident in VMEM)."""
    nd = len(shape)
    return pl.BlockSpec(shape, lambda b, l, _nd=nd: (0,) * _nd)


def _shard_spec(shape):
    """Leading batch-shard dim squeezed; block indexed by the shard grid axis."""
    nz = len(shape)
    return pl.BlockSpec((None,) + shape, lambda b, l, _nz=nz: (b,) + (0,) * _nz)


def _layer_spec(shape):
    """Leading layer dim squeezed; block indexed by the layer grid axis (prefetched)."""
    nz = len(shape)
    return pl.BlockSpec((None,) + shape, lambda b, l, _nz=nz: (l,) + (0,) * _nz)


def transformer_classifier_forward(params, input_ids, attention_mask,
                                   num_shards=NUM_BATCH_SHARDS):
    """Mirrors TransformerClassifier1.forward: encoder -> CLS embedding -> classifier."""
    B, S = input_ids.shape
    assert B % num_shards == 0
    b_local = B // num_shards
    bsl = b_local * S

    # Tiny one-time wrapper-side prep (no HBM round-trips of activations):
    onehot = jax.nn.one_hot(input_ids.reshape(num_shards, bsl), VOCAB, dtype=jnp.bfloat16)
    # combined additive mask for the folded (B*S x B*S) score tiles:
    # key-padding + cross-batch blocking.
    key_ok = attention_mask.reshape(num_shards, bsl).astype(jnp.float32) > 0
    row_b = jnp.arange(bsl) // S
    same_batch = row_b[:, None] == row_b[None, :]
    mask = jnp.where(same_batch[None] & key_ok[:, None, :], 0.0, -1e9).astype(jnp.float32)
    pos_tiled = jnp.tile(params["pos_emb"], (b_local, 1))          # (B*S, D) f32

    args = (onehot, mask,
            params["tok_emb"], pos_tiled, params["const_vec"],
            params["wqkv"], params["wo"], params["w1"], params["w2"], params["layer_vec"],
            params["cls_w1"], params["cls_w2"])

    in_specs = [
        _shard_spec((bsl, VOCAB)),               # onehot
        _shard_spec((bsl, bsl)),                 # additive attention mask
        _const_spec((VOCAB, HIDDEN)),            # tok_emb
        _const_spec((bsl, HIDDEN)),              # pos_emb (pre-tiled over folded batch)
        _const_spec((VEC_ROWS, 128)),            # packed const slab (emb LN + cls biases)
        _layer_spec((HIDDEN, 3 * HIDDEN)),       # wqkv
        _layer_spec((HIDDEN, HIDDEN)),           # wo
        _layer_spec((HIDDEN, FFN)),              # w1
        _layer_spec((FFN, HIDDEN)),              # w2
        _layer_spec((VEC_ROWS, 3 * HIDDEN)),     # packed per-layer slab (biases + LN)
        _const_spec((HIDDEN, CLS_HIDDEN_PAD)),   # cls_w1
        _const_spec((CLS_HIDDEN_PAD, OUT_PAD)),  # cls_w2
    ]

    out = pl.pallas_call(
        functools.partial(fused_forward_kernel, num_heads=NUM_HEADS),
        out_shape=jax.ShapeDtypeStruct((num_shards, bsl, OUT_PAD), jnp.float32),
        grid=(num_shards, NUM_LAYERS),
        in_specs=in_specs,
        out_specs=_shard_spec((bsl, OUT_PAD)),
        scratch_shapes=[pltpu.VMEM((bsl, HIDDEN), jnp.float32)],   # resident residual stream
        compiler_params=pltpu.CompilerParams(
            dimension_semantics=("parallel", "arbitrary")),        # shards across TCs on v7x
    )(*args)

    return out.reshape(B, S, OUT_PAD)[:, 0, :NUM_CLASSES]          # (B, 1)


# ----------------------------- deterministic parameter init -----------------------------
def init_params(key):
    def dense(k, fan_in, fan_out):
        return (0.02 * jax.random.normal(k, (fan_in, fan_out), jnp.float32)).astype(jnp.bfloat16)

    keys = jax.random.split(key, 3 + NUM_LAYERS)
    params = {
        "tok_emb": dense(keys[0], VOCAB, HIDDEN),
        "pos_emb": 0.02 * jax.random.normal(keys[1], (SEQ, HIDDEN), jnp.float32),
    }

    # packed const slab rows: 0 emb_ln_gamma, 1 emb_ln_beta, 2 cls_b1, 3 cls_b2
    params["const_vec"] = jnp.zeros((VEC_ROWS, 128), jnp.float32).at[0, :HIDDEN].set(1.0)

    wqkv, wo, w1, w2, lvec = [], [], [], [], []
    for i in range(NUM_LAYERS):
        lk = jax.random.split(keys[2 + i], 6)
        wq = dense(lk[0], HIDDEN, HIDDEN)
        wk = dense(lk[1], HIDDEN, HIDDEN)
        wv = dense(lk[2], HIDDEN, HIDDEN)
        wqkv.append(jnp.concatenate([wq, wk, wv], axis=1))          # fused (D, 3D) bf16
        wo.append(dense(lk[3], HIDDEN, HIDDEN))
        w1.append(dense(lk[4], HIDDEN, FFN))
        w2.append(dense(lk[5], FFN, HIDDEN))
        # packed slab rows: 0 bqkv, 1 bo, 2 b1, 3 b2, 4 ln1_g, 5 ln1_b, 6 ln2_g, 7 ln2_b
        v = jnp.zeros((VEC_ROWS, 3 * HIDDEN), jnp.float32)
        v = v.at[4, :HIDDEN].set(1.0)                               # ln1 gamma
        v = v.at[6, :HIDDEN].set(1.0)                               # ln2 gamma
        lvec.append(v)

    params.update({
        "wqkv": jnp.stack(wqkv), "wo": jnp.stack(wo),
        "w1": jnp.stack(w1), "w2": jnp.stack(w2),
        "layer_vec": jnp.stack(lvec),
    })

    ck = jax.random.split(keys[2 + NUM_LAYERS], 2)
    cw1 = 0.02 * jax.random.normal(ck[0], (HIDDEN, CLS_HIDDEN), jnp.float32)
    cw2 = 0.02 * jax.random.normal(ck[1], (CLS_HIDDEN, NUM_CLASSES), jnp.float32)
    # zero-pad 50 -> 128 hidden lanes and 1 -> 128 logit lanes (exact: ReLU(0)=0 and the
    # padded rows/cols of cls_w2 are zero, so the real logit is unchanged).
    cw1p = jnp.zeros((HIDDEN, CLS_HIDDEN_PAD), jnp.float32).at[:, :CLS_HIDDEN].set(cw1)
    cw2p = jnp.zeros((CLS_HIDDEN_PAD, OUT_PAD), jnp.float32).at[:CLS_HIDDEN, :NUM_CLASSES].set(cw2)
    params["cls_w1"] = cw1p.astype(jnp.bfloat16)
    params["cls_w2"] = cw2p.astype(jnp.bfloat16)
    return params


if __name__ == "__main__":
    key = jax.random.PRNGKey(0)
    k_param, k_ids = jax.random.split(key)

    params = init_params(k_param)

    input_ids = jax.random.randint(k_ids, (BATCH, SEQ), 0, VOCAB, dtype=jnp.int32)
    # padding mask: second example has its last 3 positions padded
    attention_mask = jnp.array(
        [[1] * SEQ,
         [1] * (SEQ - 3) + [0] * 3], dtype=jnp.int32)

    fwd = jax.jit(transformer_classifier_forward)
    logits = fwd(params, input_ids, attention_mask)
    jax.block_until_ready(logits)

    assert logits.shape == (BATCH, NUM_CLASSES), logits.shape
    assert logits.dtype == jnp.float32
    print("KERNEL_OK")
</pallas_src>

<mosaic_0001>
module attributes {stable_mosaic.version = 11 : i64} {
  func.func @fused_forward_kernel(%arg0: i32, %arg1: i32, %arg2: memref<1x16x64xbf16, #tpu.memory_space<vmem>>, %arg3: memref<1x16x16xf32, #tpu.memory_space<vmem>>, %arg4: memref<64x128xbf16, #tpu.memory_space<vmem>>, %arg5: memref<16x128xf32, #tpu.memory_space<vmem>>, %arg6: memref<8x128xf32, #tpu.memory_space<vmem>>, %arg7: memref<1x128x384xbf16, #tpu.memory_space<vmem>>, %arg8: memref<1x128x128xbf16, #tpu.memory_space<vmem>>, %arg9: memref<1x128x256xbf16, #tpu.memory_space<vmem>>, %arg10: memref<1x256x128xbf16, #tpu.memory_space<vmem>>, %arg11: memref<1x8x384xf32, #tpu.memory_space<vmem>>, %arg12: memref<128x128xbf16, #tpu.memory_space<vmem>>, %arg13: memref<128x128xbf16, #tpu.memory_space<vmem>>, %arg14: memref<1x16x128xf32, #tpu.memory_space<vmem>>, %arg15: memref<16x128xf32, #tpu.memory_space<vmem>>) attributes {dimension_semantics = [#tpu.dimension_semantics<parallel>, #tpu.dimension_semantics<arbitrary>], iteration_bounds = array<i64: 1, 2>, scalar_prefetch = 0 : i64, scratch_operands = 1 : i64, tpu.core_type = #tpu.core_type<tc>, window_params = [{transform_indices = @transform_0, window_bounds = array<i64: 1, 16, 64>}, {transform_indices = @transform_1, window_bounds = array<i64: 1, 16, 16>}, {pipeline_mode = #tpu.pipeline_mode<synchronous>, transform_indices = @transform_2, window_bounds = array<i64: 64, 128>}, {pipeline_mode = #tpu.pipeline_mode<synchronous>, transform_indices = @transform_3, window_bounds = array<i64: 16, 128>}, {pipeline_mode = #tpu.pipeline_mode<synchronous>, transform_indices = @transform_4, window_bounds = array<i64: 8, 128>}, {transform_indices = @transform_5, window_bounds = array<i64: 1, 128, 384>}, {transform_indices = @transform_6, window_bounds = array<i64: 1, 128, 128>}, {transform_indices = @transform_7, window_bounds = array<i64: 1, 128, 256>}, {transform_indices = @transform_8, window_bounds = array<i64: 1, 256, 128>}, {transform_indices = @transform_9, window_bounds = array<i64: 1, 8, 384>}, {pipeline_mode = #tpu.pipeline_mode<synchronous>, transform_indices = @transform_10, window_bounds = array<i64: 128, 128>}, {pipeline_mode = #tpu.pipeline_mode<synchronous>, transform_indices = @transform_11, window_bounds = array<i64: 128, 128>}, {transform_indices = @transform_12, window_bounds = array<i64: 1, 16, 128>}]} {
    %c0 = arith.constant 0 : index
    %c0_0 = arith.constant 0 : index
    %0 = vector.load %arg6[%c0, %c0_0] : memref<8x128xf32, #tpu.memory_space<vmem>>, vector<8x128xf32>
    %c0_i32 = arith.constant 0 : i32
    %1 = arith.cmpi eq, %arg1, %c0_i32 : i32
    %2 = arith.extui %1 : i1 to i32
    %c0_i32_1 = arith.constant 0 : i32
    %3 = arith.cmpi ne, %2, %c0_i32_1 : i32
    scf.if %3 {
      %c0_48 = arith.constant 0 : index
      %c0_49 = arith.constant 0 : index
      %c0_50 = arith.constant 0 : index
      %130 = vector.load %arg2[%c0_48, %c0_49, %c0_50] : memref<1x16x64xbf16, #tpu.memory_space<vmem>>, vector<1x16x64xbf16>
      %131 = vector.shape_cast %130 : vector<1x16x64xbf16> to vector<16x64xbf16>
      %c0_51 = arith.constant 0 : index
      %c0_52 = arith.constant 0 : index
      %132 = vector.load %arg4[%c0_51, %c0_52] : memref<64x128xbf16, #tpu.memory_space<vmem>>, vector<64x128xbf16>
      %cst_53 = arith.constant dense<0.000000e+00> : vector<16x128xf32>
      %133 = tpu.matmul %131, %132, %cst_53 {dimension_numbers = #tpu.dot_dimension_numbers<[1], [0], [0], [1], [0, 0, 1, 1], [], []>} : vector<16x64xbf16>, vector<64x128xbf16>, vector<16x128xf32> -> vector<16x128xf32>
      %c0_54 = arith.constant 0 : index
      %c0_55 = arith.constant 0 : index
      %134 = vector.load %arg5[%c0_54, %c0_55] : memref<16x128xf32, #tpu.memory_space<vmem>>, vector<16x128xf32>
      %135 = arith.addf %133, %134 : vector<16x128xf32>
      %136 = vector.extract_strided_slice %0 {offsets = [0, 0], sizes = [1, 128], strides = [1, 1]} : vector<8x128xf32> to vector<1x128xf32>
      %137 = vector.extract_strided_slice %0 {offsets = [1, 0], sizes = [1, 128], strides = [1, 1]} : vector<8x128xf32> to vector<1x128xf32>
      %cst_56 = arith.constant dense<0.000000e+00> : vector<16xf32>
      %138 = vector.multi_reduction <add>, %135, %cst_56 [1] : vector<16x128xf32> to vector<16xf32>
      %139 = vector.shape_cast %138 : vector<16xf32> to vector<16x1xf32>
      %cst_57 = arith.constant 1.280000e+02 : f32
      %140 = vector.broadcast %cst_57 : f32 to vector<16x1xf32>
      %141 = arith.divf %139, %140 : vector<16x1xf32>
      %142 = vector.broadcast %141 : vector<16x1xf32> to vector<16x128xf32>
      %143 = arith.subf %135, %142 : vector<16x128xf32>
      %144 = arith.mulf %143, %143 : vector<16x128xf32>
      %cst_58 = arith.constant dense<0.000000e+00> : vector<16xf32>
      %145 = vector.multi_reduction <add>, %144, %cst_58 [1] : vector<16x128xf32> to vector<16xf32>
      %146 = vector.shape_cast %145 : vector<16xf32> to vector<16x1xf32>
      %cst_59 = arith.constant 1.280000e+02 : f32
      %147 = vector.broadcast %cst_59 : f32 to vector<16x1xf32>
      %148 = arith.divf %146, %147 : vector<16x1xf32>
      %149 = vector.broadcast %141 : vector<16x1xf32> to vector<16x128xf32>
      %150 = arith.subf %135, %149 : vector<16x128xf32>
      %cst_60 = arith.constant 9.99999996E-13 : f32
      %151 = vector.broadcast %cst_60 : f32 to vector<16x1xf32>
      %152 = arith.addf %148, %151 : vector<16x1xf32>
      %153 = math.rsqrt %152 : vector<16x1xf32>
      %154 = vector.broadcast %153 : vector<16x1xf32> to vector<16x128xf32>
      %155 = arith.mulf %150, %154 : vector<16x128xf32>
      %156 = vector.broadcast %136 : vector<1x128xf32> to vector<16x128xf32>
      %157 = arith.mulf %155, %156 : vector<16x128xf32>
      %158 = vector.broadcast %137 : vector<1x128xf32> to vector<16x128xf32>
      %159 = arith.addf %157, %158 : vector<16x128xf32>
      %c0_61 = arith.constant 0 : index
      %c0_62 = arith.constant 0 : index
      %160 = vector.load %arg15[%c0_61, %c0_62] : memref<16x128xf32, #tpu.memory_space<vmem>>, vector<16x128xf32>
      tpu.vector_store %arg15[%c0_61, %c0_62], %159 {strides = array<i32>} : memref<16x128xf32, #tpu.memory_space<vmem>>, vector<16x128xf32>,
    } else {
    }
    %c0_2 = arith.constant 0 : index
    %c0_3 = arith.constant 0 : index
    %4 = vector.load %arg15[%c0_2, %c0_3] : memref<16x128xf32, #tpu.memory_space<vmem>>, vector<16x128xf32>
    %c0_4 = arith.constant 0 : index
    %c0_5 = arith.constant 0 : index
    %c0_6 = arith.constant 0 : index
    %5 = vector.load %arg11[%c0_4, %c0_5, %c0_6] : memref<1x8x384xf32, #tpu.memory_space<vmem>>, vector<1x8x384xf32>
    %6 = vector.shape_cast %5 : vector<1x8x384xf32> to vector<8x384xf32>
    %7 = vector.extract_strided_slice %6 {offsets = [0, 0], sizes = [1, 384], strides = [1, 1]} : vector<8x384xf32> to vector<1x384xf32>
    %8 = vector.extract_strided_slice %6 {offsets = [1, 0], sizes = [1, 128], strides = [1, 1]} : vector<8x384xf32> to vector<1x128xf32>
    %9 = vector.extract_strided_slice %6 {offsets = [2, 0], sizes = [1, 256], strides = [1, 1]} : vector<8x384xf32> to vector<1x256xf32>
    %10 = vector.extract_strided_slice %6 {offsets = [3, 0], sizes = [1, 128], strides = [1, 1]} : vector<8x384xf32> to vector<1x128xf32>
    %11 = vector.extract_strided_slice %6 {offsets = [4, 0], sizes = [1, 128], strides = [1, 1]} : vector<8x384xf32> to vector<1x128xf32>
    %12 = vector.extract_strided_slice %6 {offsets = [5, 0], sizes = [1, 128], strides = [1, 1]} : vector<8x384xf32> to vector<1x128xf32>
    %13 = vector.extract_strided_slice %6 {offsets = [6, 0], sizes = [1, 128], strides = [1, 1]} : vector<8x384xf32> to vector<1x128xf32>
    %14 = vector.extract_strided_slice %6 {offsets = [7, 0], sizes = [1, 128], strides = [1, 1]} : vector<8x384xf32> to vector<1x128xf32>
    %15 = arith.truncf %4 : vector<16x128xf32> to vector<16x128xbf16>
    %c0_7 = arith.constant 0 : index
    %c0_8 = arith.constant 0 : index
    %c0_9 = arith.constant 0 : index
    %16 = vector.load %arg7[%c0_7, %c0_8, %c0_9] : memref<1x128x384xbf16, #tpu.memory_space<vmem>>, vector<1x128x384xbf16>
    %17 = vector.shape_cast %16 : vector<1x128x384xbf16> to vector<128x384xbf16>
    %cst = arith.constant dense<0.000000e+00> : vector<16x384xf32>
    %18 = tpu.matmul %15, %17, %cst {dimension_numbers = #tpu.dot_dimension_numbers<[1], [0], [0], [1], [0, 0, 1, 1], [], []>} : vector<16x128xbf16>, vector<128x384xbf16>, vector<16x384xf32> -> vector<16x384xf32>
    %19 = vector.broadcast %7 : vector<1x384xf32> to vector<16x384xf32>
    %20 = arith.addf %18, %19 : vector<16x384xf32>
    %21 = arith.truncf %20 : vector<16x384xf32> to vector<16x384xbf16>
    %22 = tpu.transpose %21, [1, 0] : vector<16x384xbf16> -> vector<384x16xbf16>
    %23 = vector.shape_cast %22 : vector<384x16xbf16> to vector<12x32x16xbf16>
    %24 = vector.extract_strided_slice %23 {offsets = [0, 0, 0], sizes = [4, 32, 16], strides = [1, 1, 1]} : vector<12x32x16xbf16> to vector<4x32x16xbf16>
    %25 = vector.extract_strided_slice %23 {offsets = [4, 0, 0], sizes = [4, 32, 16], strides = [1, 1, 1]} : vector<12x32x16xbf16> to vector<4x32x16xbf16>
    %26 = vector.extract_strided_slice %23 {offsets = [8, 0, 0], sizes = [4, 32, 16], strides = [1, 1, 1]} : vector<12x32x16xbf16> to vector<4x32x16xbf16>
    %27 = tpu.transpose %24, [0, 2, 1] : vector<4x32x16xbf16> -> vector<4x16x32xbf16>
    %cst_10 = arith.constant dense<0.000000e+00> : vector<4x16x16xf32>
    %28 = tpu.matmul %27, %25, %cst_10 {dimension_numbers = #tpu.dot_dimension_numbers<[2], [1], [1], [2], [0, 0, 0, 1, 1, 2], [0], [0]>} : vector<4x16x32xbf16>, vector<4x32x16xbf16>, vector<4x16x16xf32> -> vector<4x16x16xf32>
    %cst_11 = arith.constant 0.176776692 : f32
    %29 = vector.broadcast %cst_11 : f32 to vector<4x16x16xf32>
    %30 = arith.mulf %28, %29 : vector<4x16x16xf32>
    %c0_12 = arith.constant 0 : index
    %c0_13 = arith.constant 0 : index
    %c0_14 = arith.constant 0 : index
    %31 = vector.load %arg3[%c0_12, %c0_13, %c0_14] : memref<1x16x16xf32, #tpu.memory_space<vmem>>, vector<1x16x16xf32>
    %32 = vector.shape_cast %31 : vector<1x16x16xf32> to vector<16x16xf32>
    %33 = vector.shape_cast %32 : vector<16x16xf32> to vector<1x16x16xf32>
    %34 = vector.broadcast %33 : vector<1x16x16xf32> to vector<4x16x16xf32>
    %35 = arith.addf %30, %34 : vector<4x16x16xf32>
    %cst_15 = arith.constant dense<0xFF800000> : vector<4x16xf32>
    %36 = vector.multi_reduction <maximumf>, %35, %cst_15 [2] : vector<4x16x16xf32> to vector<4x16xf32>
    %37 = vector.shape_cast %36 : vector<4x16xf32> to vector<4x16x1xf32>
    %38 = vector.broadcast %37 : vector<4x16x1xf32> to vector<4x16x16xf32>
    %39 = arith.subf %35, %38 : vector<4x16x16xf32>
    %40 = math.exp %39 : vector<4x16x16xf32>
    %cst_16 = arith.constant dense<0.000000e+00> : vector<4x16xf32>
    %41 = vector.multi_reduction <add>, %40, %cst_16 [2] : vector<4x16x16xf32> to vector<4x16xf32>
    %42 = vector.shape_cast %41 : vector<4x16xf32> to vector<4x16x1xf32>
    %43 = vector.broadcast %42 : vector<4x16x1xf32> to vector<4x16x16xf32>
    %44 = arith.divf %40, %43 : vector<4x16x16xf32>
    %45 = arith.truncf %44 : vector<4x16x16xf32> to vector<4x16x16xbf16>
    %cst_17 = arith.constant dense<0.000000e+00> : vector<4x16x32xf32>
    %46 = tpu.matmul %45, %26, %cst_17 {dimension_numbers = #tpu.dot_dimension_numbers<[2], [2], [1], [1], [0, 0, 0, 1, 1, 1], [0], [0]>} : vector<4x16x16xbf16>, vector<4x32x16xbf16>, vector<4x16x32xf32> -> vector<4x16x32xf32>
    %c0_18 = arith.constant 0 : index
    %c0_19 = arith.constant 0 : index
    %c0_20 = arith.constant 0 : index
    %47 = vector.load %arg8[%c0_18, %c0_19, %c0_20] : memref<1x128x128xbf16, #tpu.memory_space<vmem>>, vector<1x128x128xbf16>
    %48 = vector.shape_cast %47 : vector<1x128x128xbf16> to vector<128x128xbf16>
    %49 = vector.shape_cast %48 : vector<128x128xbf16> to vector<4x32x128xbf16>
    %50 = arith.truncf %46 : vector<4x16x32xf32> to vector<4x16x32xbf16>
    %cst_21 = arith.constant dense<0.000000e+00> : vector<4x16x128xf32>
    %51 = tpu.matmul %50, %49, %cst_21 {dimension_numbers = #tpu.dot_dimension_numbers<[2], [1], [1], [2], [0, 0, 0, 1, 1, 2], [0], [0]>} : vector<4x16x32xbf16>, vector<4x32x128xbf16>, vector<4x16x128xf32> -> vector<4x16x128xf32>
    %cst_22 = arith.constant dense<0.000000e+00> : vector<16x128xf32>
    %52 = vector.multi_reduction <add>, %51, %cst_22 [0] : vector<4x16x128xf32> to vector<16x128xf32>
    %53 = vector.broadcast %8 : vector<1x128xf32> to vector<16x128xf32>
    %54 = arith.addf %52, %53 : vector<16x128xf32>
    %55 = arith.addf %4, %54 : vector<16x128xf32>
    %cst_23 = arith.constant dense<0.000000e+00> : vector<16xf32>
    %56 = vector.multi_reduction <add>, %55, %cst_23 [1] : vector<16x128xf32> to vector<16xf32>
    %57 = vector.shape_cast %56 : vector<16xf32> to vector<16x1xf32>
    %cst_24 = arith.constant 1.280000e+02 : f32
    %58 = vector.broadcast %cst_24 : f32 to vector<16x1xf32>
    %59 = arith.divf %57, %58 : vector<16x1xf32>
    %60 = vector.broadcast %59 : vector<16x1xf32> to vector<16x128xf32>
    %61 = arith.subf %55, %60 : vector<16x128xf32>
    %62 = arith.mulf %61, %61 : vector<16x128xf32>
    %cst_25 = arith.constant dense<0.000000e+00> : vector<16xf32>
    %63 = vector.multi_reduction <add>, %62, %cst_25 [1] : vector<16x128xf32> to vector<16xf32>
    %64 = vector.shape_cast %63 : vector<16xf32> to vector<16x1xf32>
    %cst_26 = arith.constant 1.280000e+02 : f32
    %65 = vector.broadcast %cst_26 : f32 to vector<16x1xf32>
    %66 = arith.divf %64, %65 : vector<16x1xf32>
    %67 = vector.broadcast %59 : vector<16x1xf32> to vector<16x128xf32>
    %68 = arith.subf %55, %67 : vector<16x128xf32>
    %cst_27 = arith.constant 9.99999996E-13 : f32
    %69 = vector.broadcast %cst_27 : f32 to vector<16x1xf32>
    %70 = arith.addf %66, %69 : vector<16x1xf32>
    %71 = math.rsqrt %70 : vector<16x1xf32>
    %72 = vector.broadcast %71 : vector<16x1xf32> to vector<16x128xf32>
    %73 = arith.mulf %68, %72 : vector<16x128xf32>
    %74 = vector.broadcast %11 : vector<1x128xf32> to vector<16x128xf32>
    %75 = arith.mulf %73, %74 : vector<16x128xf32>
    %76 = vector.broadcast %12 : vector<1x128xf32> to vector<16x128xf32>
    %77 = arith.addf %75, %76 : vector<16x128xf32>
    %78 = arith.truncf %77 : vector<16x128xf32> to vector<16x128xbf16>
    %c0_28 = arith.constant 0 : index
    %c0_29 = arith.constant 0 : index
    %c0_30 = arith.constant 0 : index
    %79 = vector.load %arg9[%c0_28, %c0_29, %c0_30] : memref<1x128x256xbf16, #tpu.memory_space<vmem>>, vector<1x128x256xbf16>
    %80 = vector.shape_cast %79 : vector<1x128x256xbf16> to vector<128x256xbf16>
    %cst_31 = arith.constant dense<0.000000e+00> : vector<16x256xf32>
    %81 = tpu.matmul %78, %80, %cst_31 {dimension_numbers = #tpu.dot_dimension_numbers<[1], [0], [0], [1], [0, 0, 1, 1], [], []>} : vector<16x128xbf16>, vector<128x256xbf16>, vector<16x256xf32> -> vector<16x256xf32>
    %82 = vector.broadcast %9 : vector<1x256xf32> to vector<16x256xf32>
    %83 = arith.addf %81, %82 : vector<16x256xf32>
    %84 = arith.mulf %83, %83 : vector<16x256xf32>
    %85 = arith.mulf %83, %84 : vector<16x256xf32>
    %cst_32 = arith.constant 4.471500e-02 : f32
    %86 = vector.broadcast %cst_32 : f32 to vector<16x256xf32>
    %87 = arith.mulf %86, %85 : vector<16x256xf32>
    %88 = arith.addf %83, %87 : vector<16x256xf32>
    %cst_33 = arith.constant 0.797884583 : f32
    %89 = vector.broadcast %cst_33 : f32 to vector<16x256xf32>
    %90 = arith.mulf %89, %88 : vector<16x256xf32>
    %91 = math.tanh %90 : vector<16x256xf32>
    %cst_34 = arith.constant 1.000000e+00 : f32
    %92 = vector.broadcast %cst_34 : f32 to vector<16x256xf32>
    %93 = arith.addf %92, %91 : vector<16x256xf32>
    %cst_35 = arith.constant 5.000000e-01 : f32
    %94 = vector.broadcast %cst_35 : f32 to vector<16x256xf32>
    %95 = arith.mulf %94, %93 : vector<16x256xf32>
    %96 = arith.mulf %83, %95 : vector<16x256xf32>
    %97 = arith.truncf %96 : vector<16x256xf32> to vector<16x256xbf16>
    %c0_36 = arith.constant 0 : index
    %c0_37 = arith.constant 0 : index
    %c0_38 = arith.constant 0 : index
    %98 = vector.load %arg10[%c0_36, %c0_37, %c0_38] : memref<1x256x128xbf16, #tpu.memory_space<vmem>>, vector<1x256x128xbf16>
    %99 = vector.shape_cast %98 : vector<1x256x128xbf16> to vector<256x128xbf16>
    %cst_39 = arith.constant dense<0.000000e+00> : vector<16x128xf32>
    %100 = tpu.matmul %97, %99, %cst_39 {dimension_numbers = #tpu.dot_dimension_numbers<[1], [0], [0], [1], [0, 0, 1, 1], [], []>} : vector<16x256xbf16>, vector<256x128xbf16>, vector<16x128xf32> -> vector<16x128xf32>
    %101 = vector.broadcast %10 : vector<1x128xf32> to vector<16x128xf32>
    %102 = arith.addf %100, %101 : vector<16x128xf32>
    %103 = arith.addf %77, %102 : vector<16x128xf32>
    %cst_40 = arith.constant dense<0.000000e+00> : vector<16xf32>
    %104 = vector.multi_reduction <add>, %103, %cst_40 [1] : vector<16x128xf32> to vector<16xf32>
    %105 = vector.shape_cast %104 : vector<16xf32> to vector<16x1xf32>
    %cst_41 = arith.constant 1.280000e+02 : f32
    %106 = vector.broadcast %cst_41 : f32 to vector<16x1xf32>
    %107 = arith.divf %105, %106 : vector<16x1xf32>
    %108 = vector.broadcast %107 : vector<16x1xf32> to vector<16x128xf32>
    %109 = arith.subf %103, %108 : vector<16x128xf32>
    %110 = arith.mulf %109, %109 : vector<16x128xf32>
    %cst_42 = arith.constant dense<0.000000e+00> : vector<16xf32>
    %111 = vector.multi_reduction <add>, %110, %cst_42 [1] : vector<16x128xf32> to vector<16xf32>
    %112 = vector.shape_cast %111 : vector<16xf32> to vector<16x1xf32>
    %cst_43 = arith.constant 1.280000e+02 : f32
    %113 = vector.broadcast %cst_43 : f32 to vector<16x1xf32>
    %114 = arith.divf %112, %113 : vector<16x1xf32>
    %115 = vector.broadcast %107 : vector<16x1xf32> to vector<16x128xf32>
    %116 = arith.subf %103, %115 : vector<16x128xf32>
    %cst_44 = arith.constant 9.99999996E-13 : f32
    %117 = vector.broadcast %cst_44 : f32 to vector<16x1xf32>
    %118 = arith.addf %114, %117 : vector<16x1xf32>
    %119 = math.rsqrt %118 : vector<16x1xf32>
    %120 = vector.broadcast %119 : vector<16x1xf32> to vector<16x128xf32>
    %121 = arith.mulf %116, %120 : vector<16x128xf32>
    %122 = vector.broadcast %13 : vector<1x128xf32> to vector<16x128xf32>
    %123 = arith.mulf %121, %122 : vector<16x128xf32>
    %124 = vector.broadcast %14 : vector<1x128xf32> to vector<16x128xf32>
    %125 = arith.addf %123, %124 : vector<16x128xf32>
    %c0_45 = arith.constant 0 : index
    %c0_46 = arith.constant 0 : index
    %126 = vector.load %arg15[%c0_45, %c0_46] : memref<16x128xf32, #tpu.memory_space<vmem>>, vector<16x128xf32>
    tpu.vector_store %arg15[%c0_45, %c0_46], %125 {strides = array<i32>} : memref<16x128xf32, #tpu.memory_space<vmem>>, vector<16x128xf32>,
    %c1_i32 = arith.constant 1 : i32
    %127 = arith.cmpi eq, %arg1, %c1_i32 : i32
    %128 = arith.extui %127 : i1 to i32
    %c0_i32_47 = arith.constant 0 : i32
    %129 = arith.cmpi ne, %128, %c0_i32_47 : i32
    scf.if %129 {
      %130 = arith.truncf %125 : vector<16x128xf32> to vector<16x128xbf16>
      %c0_48 = arith.constant 0 : index
      %c0_49 = arith.constant 0 : index
      %131 = vector.load %arg12[%c0_48, %c0_49] : memref<128x128xbf16, #tpu.memory_space<vmem>>, vector<128x128xbf16>
      %cst_50 = arith.constant dense<0.000000e+00> : vector<16x128xf32>
      %132 = tpu.matmul %130, %131, %cst_50 {dimension_numbers = #tpu.dot_dimension_numbers<[1], [0], [0], [1], [0, 0, 1, 1], [], []>} : vector<16x128xbf16>, vector<128x128xbf16>, vector<16x128xf32> -> vector<16x128xf32>
      %133 = vector.extract_strided_slice %0 {offsets = [2, 0], sizes = [1, 128], strides = [1, 1]} : vector<8x128xf32> to vector<1x128xf32>
      %134 = vector.broadcast %133 : vector<1x128xf32> to vector<16x128xf32>
      %135 = arith.addf %132, %134 : vector<16x128xf32>
      %cst_51 = arith.constant 0.000000e+00 : f32
      %136 = vector.broadcast %cst_51 : f32 to vector<16x128xf32>
      %137 = arith.maximumf %135, %136 : vector<16x128xf32>
      %138 = arith.truncf %137 : vector<16x128xf32> to vector<16x128xbf16>
      %c0_52 = arith.constant 0 : index
      %c0_53 = arith.constant 0 : index
      %139 = vector.load %arg13[%c0_52, %c0_53] : memref<128x128xbf16, #tpu.memory_space<vmem>>, vector<128x128xbf16>
      %cst_54 = arith.constant dense<0.000000e+00> : vector<16x128xf32>
      %140 = tpu.matmul %138, %139, %cst_54 {dimension_numbers = #tpu.dot_dimension_numbers<[1], [0], [0], [1], [0, 0, 1, 1], [], []>} : vector<16x128xbf16>, vector<128x128xbf16>, vector<16x128xf32> -> vector<16x128xf32>
      %141 = vector.extract_strided_slice %0 {offsets = [3, 0], sizes = [1, 128], strides = [1, 1]} : vector<8x128xf32> to vector<1x128xf32>
      %142 = vector.broadcast %141 : vector<1x128xf32> to vector<16x128xf32>
      %143 = arith.addf %140, %142 : vector<16x128xf32>
      %c0_55 = arith.constant 0 : index
      %c0_56 = arith.constant 0 : index
      %c0_57 = arith.constant 0 : index
      %144 = vector.load %arg14[%c0_55, %c0_56, %c0_57] : memref<1x16x128xf32, #tpu.memory_space<vmem>>, vector<1x16x128xf32>
      %145 = vector.shape_cast %144 : vector<1x16x128xf32> to vector<16x128xf32>
      %146 = vector.shape_cast %143 : vector<16x128xf32> to vector<1x16x128xf32>
      tpu.vector_store %arg14[%c0_55, %c0_56, %c0_57], %146 {strides = array<i32>} : memref<1x16x128xf32, #tpu.memory_space<vmem>>, vector<1x16x128xf32>,
    } else {
    }
    return
  }
  func.func @transform_0(%arg0: i32, %arg1: i32) -> (i32, i32, i32) {
    %c0_i32 = arith.constant 0 : i32
    %c0_i32_0 = arith.constant 0 : i32
    %c0_i32_1 = arith.constant 0 : i32
    return %arg0, %c0_i32, %c0_i32_0 : i32, i32, i32
  }
  func.func @transform_1(%arg0: i32, %arg1: i32) -> (i32, i32, i32) {
    %c0_i32 = arith.constant 0 : i32
    %c0_i32_0 = arith.constant 0 : i32
    %c0_i32_1 = arith.constant 0 : i32
    return %arg0, %c0_i32, %c0_i32_0 : i32, i32, i32
  }
  func.func @transform_2(%arg0: i32, %arg1: i32) -> (i32, i32) {
    %c0_i32 = arith.constant 0 : i32
    %c0_i32_0 = arith.constant 0 : i32
    %c0_i32_1 = arith.constant 0 : i32
    return %c0_i32, %c0_i32_0 : i32, i32
  }
  func.func @transform_3(%arg0: i32, %arg1: i32) -> (i32, i32) {
    %c0_i32 = arith.constant 0 : i32
    %c0_i32_0 = arith.constant 0 : i32
    %c0_i32_1 = arith.constant 0 : i32
    return %c0_i32, %c0_i32_0 : i32, i32
  }
  func.func @transform_4(%arg0: i32, %arg1: i32) -> (i32, i32) {
    %c0_i32 = arith.constant 0 : i32
    %c0_i32_0 = arith.constant 0 : i32
    %c0_i32_1 = arith.constant 0 : i32
    return %c0_i32, %c0_i32_0 : i32, i32
  }
  func.func @transform_5(%arg0: i32, %arg1: i32) -> (i32, i32, i32) {
    %c0_i32 = arith.constant 0 : i32
    %c0_i32_0 = arith.constant 0 : i32
    %c0_i32_1 = arith.constant 0 : i32
    return %arg1, %c0_i32, %c0_i32_0 : i32, i32, i32
  }
  func.func @transform_6(%arg0: i32, %arg1: i32) -> (i32, i32, i32) {
    %c0_i32 = arith.constant 0 : i32
    %c0_i32_0 = arith.constant 0 : i32
    %c0_i32_1 = arith.constant 0 : i32
    return %arg1, %c0_i32, %c0_i32_0 : i32, i32, i32
  }
  func.func @transform_7(%arg0: i32, %arg1: i32) -> (i32, i32, i32) {
    %c0_i32 = arith.constant 0 : i32
    %c0_i32_0 = arith.constant 0 : i32
    %c0_i32_1 = arith.constant 0 : i32
    return %arg1, %c0_i32, %c0_i32_0 : i32, i32, i32
  }
  func.func @transform_8(%arg0: i32, %arg1: i32) -> (i32, i32, i32) {
    %c0_i32 = arith.constant 0 : i32
    %c0_i32_0 = arith.constant 0 : i32
    %c0_i32_1 = arith.constant 0 : i32
    return %arg1, %c0_i32, %c0_i32_0 : i32, i32, i32
  }
  func.func @transform_9(%arg0: i32, %arg1: i32) -> (i32, i32, i32) {
    %c0_i32 = arith.constant 0 : i32
    %c0_i32_0 = arith.constant 0 : i32
    %c0_i32_1 = arith.constant 0 : i32
    return %arg1, %c0_i32, %c0_i32_0 : i32, i32, i32
  }
  func.func @transform_10(%arg0: i32, %arg1: i32) -> (i32, i32) {
    %c0_i32 = arith.constant 0 : i32
    %c0_i32_0 = arith.constant 0 : i32
    %c0_i32_1 = arith.constant 0 : i32
    return %c0_i32, %c0_i32_0 : i32, i32
  }
  func.func @transform_11(%arg0: i32, %arg1: i32) -> (i32, i32) {
    %c0_i32 = arith.constant 0 : i32
    %c0_i32_0 = arith.constant 0 : i32
    %c0_i32_1 = arith.constant 0 : i32
    return %c0_i32, %c0_i32_0 : i32, i32
  }
  func.func @transform_12(%arg0: i32, %arg1: i32) -> (i32, i32, i32) {
    %c0_i32 = arith.constant 0 : i32
    %c0_i32_0 = arith.constant 0 : i32
    %c0_i32_1 = arith.constant 0 : i32
    return %arg0, %c0_i32, %c0_i32_0 : i32, i32, i32
  }
}

</mosaic_0001>

<bundles_post_ra>
// kernel: transformer_classifier_forward.1
= control target key start
LH: loop header
LB: loop body
LE: loop exit
PB: predicated region body
PF: predicated region fallthrough
CT: control target
= control target key end

     0   :  { %s3980_s0 = inlined_call_operand.vmem [shape: bf16[1,16,64], index: 0, kind: input, shape index: {}]   ;;  %s3981_s1 = inlined_call_operand.vmem [shape: f32[1,16,16], index: 1, kind: input, shape index: {}]   ;;  %s3982_s2 = inlined_call_operand.hbm [shape: bf16[64,128], index: 2, kind: input, shape index: {}]   ;;  %s3983_s3 = inlined_call_operand.vmem [shape: f32[16,128], index: 3, kind: input, shape index: {}]   ;;  %s3984_s4 = inlined_call_operand.vmem [shape: f32[8,128], index: 4, kind: input, shape index: {}]   ;;  %s3985_s5 = inlined_call_operand.hbm [shape: bf16[2,128,384], index: 5, kind: input, shape index: {}]   ;;  %s3986_s6 = inlined_call_operand.hbm [shape: bf16[2,128,128], index: 6, kind: input, shape index: {}]   ;;  %s3987_s7 = inlined_call_operand.hbm [shape: bf16[2,128,256], index: 7, kind: input, shape index: {}]   ;;  %s3988_s8 = inlined_call_operand.hbm [shape: bf16[2,256,128], index: 8, kind: input, shape index: {}]   ;;  %s3989_s9 = inlined_call_operand.vmem [shape: f32[2,8,384], index: 9, kind: input, shape index: {}]   ;;  %s3990_s10 = inlined_call_operand.hbm [shape: bf16[128,128], index: 10, kind: input, shape index: {}]   ;;  %s3991_s11 = inlined_call_operand.hbm [shape: bf16[128,128], index: 11, kind: input, shape index: {}]   ;;  %s3992_s12 = inlined_call_operand.vmem [shape: f32[1,16,128], index: 12, kind: output, shape index: {}]  }
   0x1   :  { %4006 = sst [smem:[#allocation23_spill]] %s3980_s0 }
   0x2   :  { %4007 = sst [smem:[#allocation24_spill]] %s3981_s1 }
   0x3   :  { %4008 = sst [smem:[#allocation25_spill]] %s3983_s3 }
   0x4   :  { %4009 = sst [smem:[#allocation26_spill]] %s3984_s4 }
   0x5   :  { %4010 = sst [smem:[#allocation27_spill]] %s3985_s5 }
   0x6   :  { %4011 = sst [smem:[#allocation28_spill]] %s3987_s7 }
   0x7   :  { %4012 = sst [smem:[#allocation29_spill]] %s3989_s9 }
   0x8   :  { %4013 = sst [smem:[#allocation30_spill]] %s3990_s10 }
   0x9   :  { %4014 = sst [smem:[#allocation31_spill]] %s3992_s12 }
   0xa   :  { %17 = vsyncpa [#allocation4], 0 }
   0xb   :  { %18 = vsyncpa [#allocation6], 0 }
   0xc   :  { %20 = vsyncpa [#allocation6 + $0x1], 0 }
   0xd   :  { %21 = vsyncpa [#allocation9], 0 }
   0xe   :  { %23 = vsyncpa [#allocation9 + $0x1], 0 }
   0xf   :  { %24 = vsyncpa [#allocation12], 0  ;;  %s3482_s21 = smov 0   ;;  %s3484_s22 = smov 0  }
  0x10   :  { %s3486_s23 = smov 0   ;;  %s3488_s24 = smov 0  }
  0x11   :  { %s3490_s25 = smov 0   ;;  %s3492_s26 = smov 0  }
  0x12 LB: > { %4015 = sst [smem:[#allocation18_spill]] %s3392_s23  ;;  %s3993_s27 = sadd.s32 4294967295, %s3404_s26   ;;  %s3404_s26 = sphi %s3492_s26, %s30_s26   ;;  %s3400_s25 = sphi %s3490_s25, %s4046_s25   ;;  %s3396_s24 = sphi %s3488_s24, %s4045_s24   ;;  %s3392_s23 = sphi %s3486_s23, %s4041_s23   ;;  %s3388_s22 = sphi %s3484_s22, %s4044_s22   ;;  %s3384_s21 = sphi %s3482_s21, %s4043_s21  }
  0x13   : > { %4016 = sst [smem:[#allocation19_spill]] %s3396_s24  ;;  %p177_p0 = scmp.ne.s32.totalorder %s3388_s22, %s3384_s21 }
  0x14   : > { %p3514_p1 = scmp.eq.s32.totalorder %s3993_s27, 0  ;;  %p2489_p2 = scmp.ge.s32.totalorder %s3404_s26, 1 }
  0x15   : > { %p360_p3 = scmp.lt.s32.totalorder %s3404_s26, 3  ;;  %s4021_s10 = sld [smem:[#allocation30_spill]] }
  0x16   : > { %p3522_p4 = por %p3514_p1, %p177_p0  ;;  %s3406_s16 = smov [#allocation11]  }
  0x17   : > { %p3526_p5 = pnand %p2489_p2, %p360_p3  ;;  %s409_s17 = sshll.u32 %s3406_s16, 4  ;;  %s410_s17 = int_to_ptr.vmem [resolvable:$true] %s409_s17 }
  0x18   : > { %s4018_s29 = scalar_select %p3522_p4, 1, 0 }
  0x19   : > { %p2984_p6 = pneg %p3526_p5  ;;  %s3994_s19 = smov 64  }
  0x1a   : > { %4019 = sst [smem:[#allocation20_spill]] %s4018_s29  ;;  %s3996_s20 = smov 4  }
  0x1b   : > { %s407_s15 = sshll.u32 %s4021_s10, 4  ;;  %p3537_p7 = pnand %p2984_p6, %p3514_p1  ;;  %s408_s15 = int_to_ptr.hbm [resolvable:$true] %s407_s15 }
  0x1c   : > { %s39_s21 = sadd.s32 1, %s3400_s25  ;;  %s164_s13 = sadd.s32 1, %s3392_s23 }
  0x1d   : > { %2990 = dma.hbm_to_vmem [thread:$0]  (!%p3537_p7), %s408_s15, 1024, %s410_s17, [#allocation12], %s3994_s19, %s3994_s19, %s3996_s20  }
  0x1e   : > { %p40_p8 = scmp.ge.s32.totalorder %s39_s21, 2  ;;  %p171_p9 = scmp.ne.s32.totalorder %s3392_s23, %s3388_s22 }
  0x1f   : > { %p172_p10 = scmp.eq.s32.totalorder %s3404_s26, 0  ;;  %p3010_p12 = scmp.lt.s32.totalorder %s3404_s26, 2 }
  0x20   : > { %s4048_s21 = smov (%p40_p8, %s39_s21), 0  ;;  %s437_s16 = sand.u32 1, %s3404_s26  }
  0x21   : > { %4023 = sst [smem:[#allocation21_spill]] %s4048_s21  ;;  %p173_p11 = por %p172_p10, %p171_p9 }
  0x22   : > { %s161_s14 = ssub.s32 %s3400_s25, %s4048_s21  ;;  %s3558_s27 = sand.u32 1, %s3392_s23  }
  0x23   : > { %p162_p13 = scmp.eq.s32.totalorder %s161_s14, 0  ;;  %s2961_s10 = smul.u32 192, %s3400_s25 }
  0x24   : > { %s2960_s17 = smul.u32 192, %s3558_s27  ;;  %s4025_s5 = sld [smem:[#allocation27_spill]] }
  0x25   : > { %s3562_s15 = scalar_select %p162_p13, %s3392_s23, %s164_s13  }
  0x26   : > { %p3568_p0 = pnand %p3010_p12, %p173_p11  ;;  %s441_s14 = scalar_lea.vmem [#allocation5], %s2960_s17 }
  0x27   : > { %4024 = sst [smem:[#allocation22_spill]] %s3562_s15  ;;  %s449_s21 = sshll.u32 %s441_s14, 4  ;;  %s450_s21 = int_to_ptr.vmem [resolvable:$true] %s449_s21 }
  0x28   : > { %s3572_s0 = scalar_lea.sflag [#allocation6], %s437_s16  ;;  %s3409_s13 = smov 192  }
  0x29   : > { %s3410_s15 = smov 12   ;;  %s2500_s19 = sshll.u32 %s3558_s27, 7 }
  0x2a   : > { %s446_s12 = scalar_lea.hbm %s4025_s5, %s2961_s10  ;;  %s2873_s10 = sshll.u32 %s3400_s25, 7 }
  0x2b   : > { %s447_s1 = sshll.u32 %s446_s12, 4  ;;  %s4027_s7 = sld [smem:[#allocation28_spill]]  ;;  %s448_s1 = int_to_ptr.hbm [resolvable:$true] %s447_s1 }
  0x2c   : > { %2997 = dma.hbm_to_vmem [thread:$0]  (!%p3568_p0), %s448_s1, 3072, %s450_s21, %s3572_s0, %s3409_s13, %s3409_s13, %s3410_s15  }
  0x2d   : > { %s485_s4 = scalar_lea.vmem [#allocation8], %s2500_s19  ;;  %s3582_s17 = scalar_lea.sflag [#allocation9], %s437_s16 }
  0x2e   : > { %s493_s9 = sshll.u32 %s485_s4, 4  ;;  %s3411_s14 = smov 128   ;;  %s494_s9 = int_to_ptr.vmem [resolvable:$true] %s493_s9 }
  0x2f   : > { %s3412_s24 = smov 8   ;;  %s512_s15 = scalar_lea.hbm %s3988_s8, %s2873_s10 }
  0x30   : > { %s513_s13 = sshll.u32 %s512_s15, 4  ;;  %s507_s4 = scalar_lea.vmem [#allocation10], %s2500_s19  ;;  %s3590_s13 = int_to_ptr.hbm [resolvable:$true] %s513_s13 }
  0x31   : > { %s490_s5 = scalar_lea.hbm %s4027_s7, %s2873_s10  ;;  %s387_s20 = sshll.u32 %s3982_s2, 4  ;;  %s388_s20 = int_to_ptr.hbm [resolvable:$true] %s387_s20 }
  0x32   : > { %s491_s23 = sshll.u32 %s490_s5, 4  ;;  %s515_s5 = sshll.u32 %s507_s4, 4  ;;  %s492_s23 = int_to_ptr.hbm [resolvable:$true] %s491_s23  ;;  %s516_s5 = int_to_ptr.vmem [resolvable:$true] %s515_s5 }
  0x33   : > { %3003 = dma.hbm_to_vmem [thread:$0]  (!%p3568_p0), %s492_s23, 2048, %s494_s9, %s3582_s17, %s3411_s14, %s3411_s14, %s3412_s24  }
  0x34   : > { %s421_s9 = sshll.u32 %s3991_s11, 4  ;;  %s3413_s23 = smov [#allocation3]   ;;  %s422_s9 = int_to_ptr.hbm [resolvable:$true] %s421_s9 }
  0x35   : > { %s389_s24 = sshll.u32 %s3413_s23, 4  ;;  %s4028_s10 = smov 4   ;;  %s390_s24 = int_to_ptr.vmem [resolvable:$true] %s389_s24 }
  0x36   : > { %s4029_s14 = smov 64   ;;  %s3414_s19 = smov [#allocation13]  }
  0x37   : > { %2987 = dma.hbm_to_vmem [thread:$0]  (!%p3537_p7), %s388_s20, 512, %s390_s24, [#allocation4], %s4029_s14, %s4029_s14, %s4028_s10  }
  0x38   : > { %s423_s1 = sshll.u32 %s3414_s19, 4  ;;  %s2497_s21 = sshll.u32 %s3558_s27, 6  ;;  %s424_s1 = int_to_ptr.vmem [resolvable:$true] %s423_s1 }
  0x39   : > { %2993 = dma.hbm_to_vmem [thread:$0]  (!%p3537_p7), %s422_s9, 1024, %s424_s1, [#allocation12], %s4029_s14, %s4029_s14, %s4028_s10  }
  0x3a   : > { %s2872_s7 = sshll.u32 %s3400_s25, 6  ;;  %s463_s29 = scalar_lea.vmem [#allocation7], %s2497_s21 }
  0x3b   : > { %s471_s15 = sshll.u32 %s463_s29, 4  ;;  %s468_s12 = scalar_lea.hbm %s3986_s6, %s2872_s7  ;;  %s472_s15 = int_to_ptr.vmem [resolvable:$true] %s471_s15 }
  0x3c   : > { %s469_s23 = sshll.u32 %s468_s12, 4  ;;  %535 = sbr.rel (%p3526_p5) target bundleno = 3109 (0xc25), region = 68  ;;  %s470_s23 = int_to_ptr.hbm [resolvable:$true] %s469_s23 }
  0x3d   : > { %3000 = dma.hbm_to_vmem [thread:$0]  (!%p3568_p0), %s470_s23, 1024, %s472_s15, %s3572_s0, %s4029_s14, %s4029_s14, %s4028_s10  }
  0x3e   : > { %3006 = dma.hbm_to_vmem [thread:$0]  (!%p3568_p0), %s3590_s13, 2048, %s516_s5, %s3582_s17, %s4029_s14, %s4029_s14, %s4028_s10  }
  0x41   : > { %3367 = dma.done.wait (%p3514_p1), [#allocation4], 512  }
  0x42   : > { %3369 = vsyncadd (%p3514_p1), [#allocation4], 4294966784  ;;  %s4030_s27 = sadd.s32 4294967295, %s3404_s26   ;;  %s544_s0 = sand.u32 1, %s3388_s22  }
  0x43   : > { %s542_s20 = sand.u32 1, %s4030_s27   ;;  %s2962_s3 = smul.u32 192, %s544_s0 }
  0x44   : > { %s543_s9 = scalar_lea.sflag [#allocation6], %s542_s20 }
  0x45   : > { %s3635_s24 = scalar_lea.vmem [#allocation5], %s2962_s3 }
  0x46   : > { %3371 = dma.done.wait (%p3522_p4), %s543_s9, 4096  }
  0x47   : > { %3373 = vsyncadd (%p3522_p4), %s543_s9, 4294963200  ;;  %s2508_s30 = sshll.u32 %s544_s0, 6  ;;  %s2509_s17 = sshll.u32 %s544_s0, 7 }
  0x48   : > { %s3641_s13 = scalar_lea.vmem [#allocation7], %s2508_s30  ;;  %s563_s5 = scalar_lea.sflag [#allocation9], %s542_s20 }
  0x49   : > { %s3643_s10 = scalar_lea.vmem [#allocation8], %s2509_s17 }
  0x4a   : > { %3375 = dma.done.wait (%p3522_p4), %s563_s5, 4096  }
  0x4b   : > { %3377 = vsyncadd (%p3522_p4), %s563_s5, 4294963200  ;;  %s3649_s14 = scalar_lea.vmem [#allocation10], %s2509_s17 }
  0x4c   : > { %3379 = dma.done.wait (%p3514_p1), [#allocation12], 2048  }
  0x4d   : > { %3381 = vsyncadd (%p3514_p1), [#allocation12], 4294965248  ;;  %s4032_s19 = sld [smem:[#allocation19_spill]] }
  0x4e   : > { %s4033_s15 = sld [smem:[#allocation29_spill]] }
  0x4f   : > { %s4034_s23 = sld [smem:[#allocation26_spill]] }
  0x53   : > { %p668_p2 = scmp.lt.s32.totalorder %s4032_s19, 1  ;;  %p2514_p3 = scmp.ne.s32.totalorder %s4032_s19, 0 }
  0x54   : > { %s4035_s18 = sld [smem:[#allocation23_spill]] (!%p2514_p3) }
  0x55   : > { %s669_s1 = scalar_select %p668_p2, %s4032_s19, 1  ;;  %v3665_v0 = vld [vmem:[%s4034_s23] sm:$0xff] }
  0x56   : > { %683 = sbr.rel (%p2514_p3) target bundleno = 510 (0x1fe), region = 100  ;;  %s4036_s3 = sld [smem:[#allocation25_spill]] (!%p2514_p3) }
  0x57   : > { %s2963_s21 = smul.u32 24, %s669_s1 }
  0x59   : > { %s3660_s4 = scalar_lea.vmem %s4033_s15, %s2963_s21 }
  0x5b   : > { %v2879_v1 = vld [vmem:[#allocation3 + $0x18] sm:$0xff]  ;;  %v2878_v2 = vld [vmem:[#allocation3 + $0x10] sm:$0xff]  ;;  %v2877_v3 = vld [vmem:[#allocation3 + $0x8] sm:$0xff]  ;;  %vm725_vm0 = vcmask 523264   ;;  %v3415_v12 = vmov 128.0   ;;  %v790_v41 = vperm.slane %v3665_v0, 0 }
  0x5c   : > { %733 = vmatpush.bf16.msra.mxu0 %v2879_v1  ;;  %v2876_v4 = vld [vmem:[#allocation3] sm:$0xff]  ;;  %v2875_v5 = vld [vmem:[%s4035_s18] sm:$0xff]  ;;  %v695_v9 = vld [vmem:[%s4036_s3 + $0x8] sm:$0xff]  ;;  %3074 = vrcp.f32 %v3415_v12  ;;  %v793_v44 = vperm.slane %v3665_v0, 1 }
  0x5d   : > { %v694_v6 = vld [vmem:[%s4036_s3] sm:$0xff] }
  0x60   : > { %734 = vmatpush.bf16.msra.mxu0 %v2878_v2 }
  0x62   : > { %v3075_v13 = vpop.eup %3074 }
  0x63   : > { %v748_v14 = vmul.f32 128.0, %v3075_v13  ;;  %vm752_vm1 = vweird.f32 %v3075_v13 }
  0x64   : > { %735 = vmatpush.bf16.msra.mxu0 %v2877_v3 }
  0x65   : > { %v749_v15 = vsub.f32 1.0, %v748_v14 }
  0x67   : > { %v750_v16 = vmul.f32 %v3075_v13, %v749_v15 }
  0x68   : > { %736 = vmatpush.bf16.msra.mxu0 %v2876_v4 }
  0x69   : > { %v751_v17 = vadd.f32 %v3075_v13, %v750_v16 }
  0x6b   : > { %2535 = vmatmul.msk.bf16.vlgmr.msra.gmra.mxu0 %vm725_vm0, %v2875_v5  ;;  %v753_v18 = vsel %vm752_vm1, %v3075_v13, %v751_v17 }
  0xe8   : > { %v738_v7 = vpop.f32.mrf.mxu0 }
  0xe9   : > { %v739_v8 = vadd.f32 %v738_v7, %v694_v6 }
  0xeb   : > { %743 = vadd.xlane.f32.xlu0 %v739_v8 }
  0xf0   : > { %v740_v10 = vpop.f32.mrf.mxu0 }
  0xf1   : > { %v741_v11 = vadd.f32 %v740_v10, %v695_v9 }
  0xf3   : > { %745 = vadd.xlane.f32.xlu0 %v741_v11 }
 0x15e   : > { %v744_v19 = vpop.xlane.xlu0 %743 }
 0x15f   : > { %v754_v20 = vmul.f32 %v753_v18, %v744_v19 }
 0x161   : > { %v756_v21 = vsub.f32 %v739_v8, %v754_v20 }
 0x163   : > { %v758_v22 = vmul.f32 %v756_v21, %v756_v21 }
 0x165   : > { %760 = vadd.xlane.f32.xlu1 %v758_v22 }
 0x166   : > { %v746_v23 = vpop.xlane.xlu0 %745 }
 0x167   : > { %v755_v24 = vmul.f32 %v753_v18, %v746_v23 }
 0x169   : > { %v757_v25 = vsub.f32 %v741_v11, %v755_v24 }
 0x16b   : > { %v759_v26 = vmul.f32 %v757_v25, %v757_v25 }
 0x16d   : > { %762 = vadd.xlane.f32.xlu1 %v759_v26 }
 0x1d8   : > { %v761_v27 = vpop.xlane.xlu1 %760 }
 0x1d9   : > { %v764_v28 = vmul.f32 %v761_v27, %v753_v18 }
 0x1db   : > { %v766_v29 = vadd.f32 1e-12, %v764_v28 }
 0x1dd   : > { %3076 = vrsqrt.f32 %v766_v29  ;;  %vm774_vm3 = vweird.f32 %v766_v29 }
 0x1e0   : > { %v763_v30 = vpop.xlane.xlu1 %762 }
 0x1e1   : > { %v765_v31 = vmul.f32 %v763_v30, %v753_v18 }
 0x1e3   : > { %v3077_v32 = vpop.eup %3076  ;;  %v767_v33 = vadd.f32 1e-12, %v765_v31 }
 0x1e4   : > { %v769_v34 = vmul.f32 %v3077_v32, %v766_v29  ;;  %vm775_vm2 = vweird.f32 %v3077_v32 }
 0x1e5   : > { %3078 = vrsqrt.f32 %v767_v33  ;;  %vm776_vm4 = vmor %vm774_vm3, %vm775_vm2  ;;  %vm784_vm6 = vweird.f32 %v767_v33 }
 0x1e6   : > { %v770_v35 = vmul.f32 %v3077_v32, %v769_v34 }
 0x1e8   : > { %v771_v36 = vmul.f32 0.5, %v770_v35 }
 0x1ea   : > { %v772_v37 = vsub.f32 1.5, %v771_v36 }
 0x1eb   : > { %v3079_v38 = vpop.eup %3078 }
 0x1ec   : > { %v773_v39 = vmul.f32 %v3077_v32, %v772_v37  ;;  %v779_v40 = vmul.f32 %v3079_v38, %v767_v33  ;;  %vm785_vm5 = vweird.f32 %v3079_v38 }
 0x1ed   : > { %vm786_vm7 = vmor %vm784_vm6, %vm785_vm5 }
 0x1ee   : > { %v777_v42 = vsel %vm776_vm4, %v3077_v32, %v773_v39  ;;  %v780_v43 = vmul.f32 %v3079_v38, %v779_v40 }
 0x1ef   : > { %v788_v45 = vmul.f32 %v777_v42, %v756_v21 }
 0x1f0   : > { %v781_v46 = vmul.f32 0.5, %v780_v43 }
 0x1f1   : > { %v791_v47 = vmul.f32 %v790_v41, %v788_v45 }
 0x1f2   : > { %v782_v48 = vsub.f32 1.5, %v781_v46 }
 0x1f3   : > { %v794_v49 = vadd.f32 %v793_v44, %v791_v47 }
 0x1f4   : > { %v783_v50 = vmul.f32 %v3079_v38, %v782_v48 }
 0x1f5   : > { %796 = vst [vmem:[#allocation2] sm:$0xff] %v794_v49 }
 0x1f6   : > { %v787_v51 = vsel %vm786_vm7, %v3079_v38, %v783_v50 }
 0x1f7   : > { %v789_v52 = vmul.f32 %v787_v51, %v757_v25 }
 0x1f9   : > { %v792_v53 = vmul.f32 %v790_v41, %v789_v52 }
 0x1fb   : > { %v795_v54 = vadd.f32 %v793_v44, %v792_v53 }
 0x1fd   : > { %797 = vst [vmem:[#allocation2 + $0x8] sm:$0xff] %v795_v54 }
 0x1fe PF: > { %v2622_v55 = vld [vmem:[%s3635_s24 + $0xa8] sm:$0xf]  ;;  %v2902_v56 = vld [vmem:[%s3635_s24 + $0xb0] sm:$0xf0]  ;;  %v2901_v57 = vld [vmem:[%s3635_s24 + $0xac] sm:$0xf] }
 0x1ff   : > { %v2623_v58 = vor.u32 %v2902_v56, %v2622_v55  ;;  %v2624_v59 = vld [vmem:[%s3635_s24 + $0xb4] sm:$0xf0]  ;;  %v2610_v60 = vld [vmem:[%s3635_s24 + $0x90] sm:$0xf]  ;;  %v2899_v61 = vld [vmem:[%s3635_s24 + $0x98] sm:$0xf0] }
 0x200   : > { %v2627_v62 = vor.u32 %v2901_v57, %v2624_v59  ;;  %v2898_v63 = vld [vmem:[%s3635_s24 + $0x94] sm:$0xf]  ;;  %v2612_v1 = vld [vmem:[%s3635_s24 + $0x9c] sm:$0xf0]  ;;  %v2611_v2 = vor.u32 %v2899_v61, %v2610_v60  ;;  %v2598_v4 = vld [vmem:[%s3635_s24 + $0x78] sm:$0xf] }
 0x201   : > { %967 = vmatpush.bf16.msra.mxu0 %v2623_v58  ;;  %v2615_v3 = vor.u32 %v2898_v63, %v2612_v1  ;;  %v2896_v5 = vld [vmem:[%s3635_s24 + $0x80] sm:$0xf0]  ;;  %v2895_v6 = vld [vmem:[%s3635_s24 + $0x7c] sm:$0xf]  ;;  %v2600_v7 = vld [vmem:[%s3635_s24 + $0x84] sm:$0xf0] }
 0x202   : > { %981 = vmatpush.bf16.msra.mxu1 %v2627_v62  ;;  %v2599_v8 = vor.u32 %v2896_v5, %v2598_v4  ;;  %v2603_v9 = vor.u32 %v2895_v6, %v2600_v7  ;;  %v2586_v10 = vld [vmem:[%s3635_s24 + $0x60] sm:$0xf]  ;;  %v2893_v11 = vld [vmem:[%s3635_s24 + $0x68] sm:$0xf0]  ;;  %v2892_v12 = vld [vmem:[%s3635_s24 + $0x64] sm:$0xf] }
 0x203   : > { %v2588_v13 = vld [vmem:[%s3635_s24 + $0x6c] sm:$0xf0]  ;;  %v2587_v14 = vor.u32 %v2893_v11, %v2586_v10  ;;  %v2574_v16 = vld [vmem:[%s3635_s24 + $0x48] sm:$0xf]  ;;  %v2890_v17 = vld [vmem:[%s3635_s24 + $0x50] sm:$0xf0] }
 0x204   : > { %v2591_v15 = vor.u32 %v2892_v12, %v2588_v13  ;;  %v2889_v18 = vld [vmem:[%s3635_s24 + $0x4c] sm:$0xf]  ;;  %v2576_v19 = vld [vmem:[%s3635_s24 + $0x54] sm:$0xf0]  ;;  %v2575_v20 = vor.u32 %v2890_v17, %v2574_v16  ;;  %v2562_v22 = vld [vmem:[%s3635_s24 + $0x30] sm:$0xf] }
 0x205   : > { %968 = vmatpush.bf16.msra.mxu0 %v2611_v2  ;;  %v2579_v21 = vor.u32 %v2889_v18, %v2576_v19  ;;  %v2887_v23 = vld [vmem:[%s3635_s24 + $0x38] sm:$0xf0]  ;;  %v2886_v24 = vld [vmem:[%s3635_s24 + $0x34] sm:$0xf]  ;;  %v2564_v25 = vld [vmem:[%s3635_s24 + $0x3c] sm:$0xf0] }
 0x206   : > { %982 = vmatpush.bf16.msra.mxu1 %v2615_v3  ;;  %v2563_v26 = vor.u32 %v2887_v23, %v2562_v22  ;;  %v2567_v27 = vor.u32 %v2886_v24, %v2564_v25  ;;  %v2550_v28 = vld [vmem:[%s3635_s24 + $0x18] sm:$0xf]  ;;  %v2884_v29 = vld [vmem:[%s3635_s24 + $0x20] sm:$0xf0]  ;;  %v2883_v30 = vld [vmem:[%s3635_s24 + $0x1c] sm:$0xf] }
 0x207   : > { %v2552_v31 = vld [vmem:[%s3635_s24 + $0x24] sm:$0xf0]  ;;  %v2551_v32 = vor.u32 %v2884_v29, %v2550_v28  ;;  %v2538_v34 = vld [vmem:[%s3635_s24] sm:$0xf]  ;;  %v2881_v35 = vld [vmem:[%s3635_s24 + $0x8] sm:$0xf0] }
 0x208   : > { %v2555_v33 = vor.u32 %v2883_v30, %v2552_v31  ;;  %v2880_v36 = vld [vmem:[%s3635_s24 + $0x4] sm:$0xf]  ;;  %v2540_v37 = vld [vmem:[%s3635_s24 + $0xc] sm:$0xf0]  ;;  %v2539_v38 = vor.u32 %v2881_v35, %v2538_v34  ;;  %v3713_v40 = vld [vmem:[#allocation2 + $0x8] sm:$0xff]  ;;  %vm1116_vm8 = vcmask 261120  }
 0x209   : > { %969 = vmatpush.bf16.msra.mxu0 %v2599_v8  ;;  %v3711_v39 = vld [vmem:[#allocation2] sm:$0xff]  ;;  %v2543_v41 = vor.u32 %v2880_v36, %v2540_v37  ;;  %v801_v46 = vld [vmem:[%s3660_s4 + $0x8] sm:$0xff]  ;;  %s4037_s19 = sld [smem:[#allocation24_spill]]  ;;  %vm1203_vm9 = vcmask 130048   ;;  %v2900_v23 = vld [vmem:[%s3635_s24 + $0xa0] sm:$0xf0] }
 0x20a   : > { %983 = vmatpush.bf16.msra.mxu1 %v2603_v9  ;;  %v3717_v42 = vpack.c.bf16 %v3713_v40, %v3711_v39  ;;  %v3722_v45 = vld [vmem:[%s3660_s4] sm:$0xff]  ;;  %v837_v48 = vperm.slane %v801_v46, 0  ;;  %v2618_v22 = vld [vmem:[%s3635_s24 + $0x98] sm:$0xf]  ;;  %v2606_v24 = vld [vmem:[%s3635_s24 + $0x80] sm:$0xf] }
 0x20b   : > { %v836_v47 = vperm.slane %v3722_v45, 0  ;;  %v2630_v19 = vld [vmem:[%s3635_s24 + $0xb0] sm:$0xf]  ;;  %v2619_v25 = vor.u32 %v2900_v23, %v2618_v22  ;;  %v2594_v28 = vld [vmem:[%s3635_s24 + $0x68] sm:$0xf] }
 0x20c   : > { %v2894_v29 = vld [vmem:[%s3635_s24 + $0x70] sm:$0xf0]  ;;  %v2570_v35 = vld [vmem:[%s3635_s24 + $0x38] sm:$0xf]  ;;  %v2888_v36 = vld [vmem:[%s3635_s24 + $0x40] sm:$0xf0] }
 0x20d   : > { %970 = vmatpush.bf16.msra.mxu0 %v2587_v14  ;;  %v2595_v30 = vor.u32 %v2894_v29, %v2594_v28  ;;  %v2571_v37 = vor.u32 %v2888_v36, %v2570_v35  ;;  %v2885_v46 = vld [vmem:[%s3635_s24 + $0x28] sm:$0xf0] }
 0x20e   : > { %984 = vmatpush.bf16.msra.mxu1 %v2591_v15 }
 0x20f   : > { %v3733_v15 = vld [vmem:[%s4037_s19] sm:$0xff] }
 0x211   : > { %971 = vmatpush.bf16.msra.mxu0 %v2575_v20  ;;  %v2903_v20 = vld [vmem:[%s3635_s24 + $0xb8] sm:$0xf0] }
 0x212   : > { %985 = vmatpush.bf16.msra.mxu1 %v2579_v21  ;;  %v2631_v21 = vor.u32 %v2903_v20, %v2630_v19 }
 0x214   : > { %995 = vmatpush.bf16.msra.mxu2 %v2631_v21 }
 0x215   : > { %972 = vmatpush.bf16.msra.mxu0 %v2563_v26  ;;  %v2897_v26 = vld [vmem:[%s3635_s24 + $0x88] sm:$0xf0] }
 0x216   : > { %986 = vmatpush.bf16.msra.mxu1 %v2567_v27  ;;  %v2607_v27 = vor.u32 %v2897_v26, %v2606_v24 }
 0x218   : > { %996 = vmatpush.bf16.msra.mxu2 %v2619_v25 }
 0x219   : > { %973 = vmatpush.bf16.msra.mxu0 %v2551_v32  ;;  %v2582_v32 = vld [vmem:[%s3635_s24 + $0x50] sm:$0xf] }
 0x21a   : > { %987 = vmatpush.bf16.msra.mxu1 %v2555_v33  ;;  %v2891_v33 = vld [vmem:[%s3635_s24 + $0x58] sm:$0xf0] }
 0x21b   : > { %v2583_v34 = vor.u32 %v2891_v33, %v2582_v32 }
 0x21c   : > { %997 = vmatpush.bf16.msra.mxu2 %v2607_v27 }
 0x21d   : > { %974 = vmatpush.bf16.msra.mxu0 %v2539_v38 }
 0x21e   : > { %988 = vmatpush.bf16.msra.mxu1 %v2543_v41 }
 0x220   : > { %975 = vmatmul.bf16.vlgmr.msra.gmra.mxu0 %v3717_v42  ;;  %998 = vmatpush.bf16.msra.mxu2 %v2595_v30 }
 0x221   : > { %989 = vmatmul.bf16.vlgmr.msra.gmra.mxu1 %v3717_v42 }
 0x224   : > { %999 = vmatpush.bf16.msra.mxu2 %v2583_v34 }
 0x228   : > { %1000 = vmatpush.bf16.msra.mxu2 %v2571_v37 }
 0x29d   : > { %v976_v43 = vpop.f32.mrf.mxu0 }
 0x29e   : > { %v990_v44 = vpop.f32.mrf.mxu1  ;;  %v977_v50 = vadd.f32 %v976_v43, %v836_v47 }
 0x29f   : > { %v991_v53 = vadd.f32 %v990_v44, %v837_v48  ;;  %v2558_v44 = vld [vmem:[%s3635_s24 + $0x20] sm:$0xf] }
 0x2a5   : > { %v978_v49 = vpop.f32.mrf.mxu0 }
 0x2a6   : > { %v979_v51 = vadd.f32 %v978_v49, %v836_v47  ;;  %v992_v52 = vpop.f32.mrf.mxu1  ;;  %v2546_v47 = vld [vmem:[%s3635_s24 + $0x8] sm:$0xf]  ;;  %v2882_v49 = vld [vmem:[%s3635_s24 + $0x10] sm:$0xf0]  ;;  %s4038_s24 = sld [smem:[#allocation19_spill]] }
 0x2a7   : > { %v993_v54 = vadd.f32 %v992_v52, %v837_v48  ;;  %v2559_v48 = vor.u32 %v2885_v46, %v2558_v44 }
 0x2a8   : > { %v1009_v55 = vpack.c.bf16 %v979_v51, %v977_v50  ;;  %v2547_v51 = vor.u32 %v2882_v49, %v2546_v47 }
 0x2a9   : > { %v1010_v56 = vpack.c.bf16 %v993_v54, %v991_v53  ;;  %1001 = vmatpush.bf16.msra.mxu2 %v2559_v48  ;;  %v1194_v54 = vld [vmem:[%s4037_s19 + $0x8] sm:$0xff] }
 0x2ab   : > { %1012 = vxpose.binary.xlu0.c.b16.start.end [1/2] (short) %v1010_v56, %v1009_v55, 128 }
 0x2ac   : > { %p2804_p1 = scmp.ne.s32.totalorder %s4038_s24, 1 }
 0x2ad   : > { %1002 = vmatpush.bf16.msra.mxu2 %v2547_v51 }
 0x2b0   : > { %1003 = vmatmul.bf16.vlgmr.msra.gmra.mxu2 %v3717_v42 }
 0x333   : > { %v1004_v46 = vpop.f32.mrf.mxu2 }
 0x357   : > { %v1020_v57 = vpop.trf.xlu0 }
 0x358   : > { %1052 = vxpose.xlu0.c.b16.start [1/2] (short) (narrow) %v1020_v57, 16 }
 0x35f   : > { %v1021_v58 = vpop.trf.xlu0 }
 0x367   : > { %v1022_v59 = vpop.trf.xlu0 }
 0x368   : > { %1053 = vxpose.xlu0.c.b16.end [2/2] (short) (narrow) %v1022_v59, 16 }
 0x36f   : > { %v1023_v60 = vpop.trf.xlu0 }
 0x370   : > { %1126 = vmatpush.bf16.msra.mxu3 %v1023_v60 }
 0x374   : > { %1127 = vmatpush.bf16.msra.mxu3 %v1021_v58 }
 0x377   : > { %v1024_v61 = vpop.trf.xlu0 }
 0x378   : > { %1068 = vxpose.xlu1.c.b16.start [1/2] (short) (narrow) %v1024_v61, 16 }
 0x37f   : > { %v1025_v62 = vpop.trf.xlu0 }
 0x387   : > { %v1026_v63 = vpop.trf.xlu0 }
 0x388   : > { %1069 = vxpose.xlu1.c.b16.end [2/2] (short) (narrow) %v1026_v63, 16 }
 0x38f   : > { %v1027_v1 = vpop.trf.xlu0 }
 0x390   : > { %1143 = vmatpush.bf16.msrb.mxu3 %v1027_v1 }
 0x394   : > { %1144 = vmatpush.bf16.msrb.mxu3 %v1025_v62 }
 0x397   : > { %v1028_v2 = vpop.trf.xlu0 }
 0x398   : > { %1084 = vxpose.xlu2.c.b16.start [1/2] (short) (narrow) %v1028_v2, 16 }
 0x39f   : > { %v1029_v3 = vpop.trf.xlu0 }
 0x3a7   : > { %v1030_v4 = vpop.trf.xlu0 }
 0x3a8   : > { %1085 = vxpose.xlu2.c.b16.end [2/2] (short) (narrow) %v1030_v4, 16 }
 0x3af   : > { %v1031_v5 = vpop.trf.xlu0 }
 0x3b7   : > { %v1032_v6 = vpop.trf.xlu0 }
 0x3b8   : > { %1100 = vxpose.xlu1.c.b16.start [1/2] (short) (narrow) %v1032_v6, 16 }
 0x3bf   : > { %v1033_v7 = vpop.trf.xlu0 }
 0x3c7   : > { %v1034_v8 = vpop.trf.xlu0 }
 0x3c8   : > { %1101 = vxpose.xlu1.c.b16.end [2/2] (short) (narrow) %v1034_v8, 16 }
 0x3cf   : > { %v1035_v9 = vpop.trf.xlu0 }
 0x3d0   : > { %1177 = vmatpush.bf16.msrb.mxu0 %v1035_v9 }
 0x3d4   : > { %1178 = vmatpush.bf16.msrb.mxu0 %v1033_v7 }
 0x404   : > { %v1060_v10 = vpop.trf.xlu0 }
 0x405   : > { %2632 = vmatmul.msk.bf16.vlgmr.msra.gmra.mxu3 %vm1116_vm8, %v1060_v10 }
 0x406   : > { %1160 = vmatpush.bf16.msra.mxu3 %v1031_v5 }
 0x40a   : > { %1161 = vmatpush.bf16.msra.mxu3 %v1029_v3 }
 0x424   : > { %v1076_v11 = vpop.trf.xlu1 }
 0x425   : > { %2633 = vmatmul.msk.bf16.vlgmr.msrb.gmra.mxu3 %vm1116_vm8, %v1076_v11 }
 0x439   : > { %v1092_v12 = vpop.trf.xlu2 }
 0x43a   : > { %2634 = vmatmul.msk.bf16.vlgmr.msra.gmra.mxu3 %vm1116_vm8, %v1092_v12 }
 0x464   : > { %v1108_v13 = vpop.trf.xlu1 }
 0x465   : > { %2635 = vmatmul.msk.bf16.vlgmr.msrb.gmra.mxu0 %vm1116_vm8, %v1108_v13 }
 0x488   : > { %v1129_v14 = vpop.f32.mrf.mxu3 }
 0x489   : > { %v1185_v16 = vmul.f32 0.17677669, %v1129_v14 }
 0x48b   : > { %v3736_v17 = vadd.f32 %v3733_v15, %v1185_v16 }
 0x48d   : > { %v1204_v18 = vsel %vm1203_vm9, %v3736_v17, -inf }
 0x48e   : > { %1205 = vmax.xlane.f32.xlu0 %v1204_v18 }
 0x490   : > { %v1131_v31 = vpop.f32.mrf.mxu3 }
 0x491   : > { %v1186_v56 = vmul.f32 0.17677669, %v1131_v31 }
 0x493   : > { %v1196_v58 = vadd.f32 %v1194_v54, %v1186_v56 }
 0x495   : > { %v1207_v60 = vsel %vm1203_vm9, %v1196_v58, -inf }
 0x4a8   : > { %v1146_v38 = vpop.f32.mrf.mxu3 }
 0x4a9   : > { %v1187_v41 = vmul.f32 0.17677669, %v1146_v38 }
 0x4ab   : > { %v1197_v43 = vadd.f32 %v3733_v15, %v1187_v41 }
 0x4ad   : > { %v1210_v50 = vsel %vm1203_vm9, %v1197_v43, -inf }
 0x4ae   : > { %1211 = vmax.xlane.f32.xlu2 %v1210_v50  ;;  %v802_v50 = vld [vmem:[%s3660_s4 + $0x10] sm:$0xff] }
 0x4af   : > { %v838_v51 = vperm.slane %v802_v50, 0 }
 0x4b0   : > { %v1148_v52 = vpop.f32.mrf.mxu3 }
 0x4b1   : > { %v1188_v53 = vmul.f32 0.17677669, %v1148_v52  ;;  %v1006_v52 = vpop.f32.mrf.mxu2  ;;  %v1005_v56 = vadd.f32 %v1004_v46, %v838_v51 }
 0x4b3   : > { %v1198_v55 = vadd.f32 %v1194_v54, %v1188_v53 }
 0x4b5   : > { %v1213_v57 = vsel %vm1203_vm9, %v1198_v55, -inf }
 0x4b6   : > { %1214 = vmax.xlane.f32.xlu1 %v1213_v57  ;;  %v1007_v57 = vadd.f32 %v1006_v52, %v838_v51 }
 0x4bd   : > { %v1163_v59 = vpop.f32.mrf.mxu3 }
 0x4be   : > { %v1189_v61 = vmul.f32 0.17677669, %v1163_v59  ;;  %1208 = vmax.xlane.f32.xlu1 %v1207_v60  ;;  %v1011_v60 = vpack.c.bf16 %v1007_v57, %v1005_v56 }
 0x4c0   : > { %v1199_v62 = vadd.f32 %v3733_v15, %v1189_v61 }
 0x4c2   : > { %v1216_v63 = vsel %vm1203_vm9, %v1199_v62, -inf }
 0x4c3   : > { %1217 = vmax.xlane.f32.xlu2 %v1216_v63 }
 0x4c5   : > { %v1165_v1 = vpop.f32.mrf.mxu3 }
 0x4c6   : > { %v1190_v2 = vmul.f32 0.17677669, %v1165_v1 }
 0x4c8   : > { %v1200_v3 = vadd.f32 %v1194_v54, %v1190_v2 }
 0x4ca   : > { %v1219_v4 = vsel %vm1203_vm9, %v1200_v3, -inf }
 0x4cb   : > { %1220 = vmax.xlane.f32.xlu2 %v1219_v4 }
 0x4e2   : > { %v1180_v5 = vpop.f32.mrf.mxu0 }
 0x4e3   : > { %v1191_v42 = vmul.f32 0.17677669, %v1180_v5 }
 0x4e5   : > { %v1201_v6 = vadd.f32 %v3733_v15, %v1191_v42 }
 0x4e7   : > { %v1222_v7 = vsel %vm1203_vm9, %v1201_v6, -inf }
 0x4e8   : > { %1223 = vmax.xlane.f32.xlu2 %v1222_v7 }
 0x4ea   : > { %v1182_v8 = vpop.f32.mrf.mxu0 }
 0x4eb   : > { %v1192_v9 = vmul.f32 0.17677669, %v1182_v8 }
 0x4ed   : > { %v1202_v10 = vadd.f32 %v1194_v54, %v1192_v9 }
 0x4ef   : > { %v1225_v11 = vsel %vm1203_vm9, %v1202_v10, -inf }
 0x4f0   : > { %1226 = vmax.xlane.f32.xlu1 %v1225_v11 }
 0x501   : > { %v1206_v16 = vpop.xlane.xlu0 %1205 }
 0x502   : > { %v1228_v15 = vsub.f32 %v3736_v17, %v1206_v16 }
 0x504   : > { %v1236_v23 = vmul.f32 1.442695, %v1228_v15 }
 0x521   : > { %v1212_v12 = vpop.xlane.xlu2 %1211 }
 0x522   : > { %v1230_v13 = vsub.f32 %v1197_v43, %v1212_v12 }
 0x524   : > { %v1240_v14 = vmul.f32 1.442695, %v1230_v13 }
 0x526   : > { %3080 = vpow2.f32 %v1240_v14 }
 0x529   : > { %v1215_v18 = vpop.xlane.xlu1 %1214 }
 0x52a   : > { %v1231_v19 = vsub.f32 %v1198_v55, %v1215_v18 }
 0x52c   : > { %v3770_v20 = vpop.eup %3080  ;;  %v1242_v21 = vmul.f32 1.442695, %v1231_v19 }
 0x52d   : > { %v1258_v22 = vsel %vm1203_vm9, %v3770_v20, 0.0 }
 0x52e   : > { %3082 = vpow2.f32 %v1242_v21  ;;  %1259 = vadd.xlane.f32.xlu2 %v1258_v22 }
 0x52f   : > { %3084 = vpow2.f32 %v1236_v23 }
 0x531   : > { %v1209_v24 = vpop.xlane.xlu1 %1208 }
 0x532   : > { %v1229_v26 = vsub.f32 %v1196_v58, %v1209_v24 }
 0x534   : > { %v3775_v25 = vpop.eup %3082  ;;  %v1238_v30 = vmul.f32 1.442695, %v1229_v26 }
 0x535   : > { %v1261_v27 = vsel %vm1203_vm9, %v3775_v25, 0.0  ;;  %v3779_v31 = vpop.eup %3084 }
 0x536   : > { %1262 = vadd.xlane.f32.xlu1 %v1261_v27  ;;  %v1218_v28 = vpop.xlane.xlu2 %1217  ;;  %v1252_v32 = vsel %vm1203_vm9, %v3779_v31, 0.0 }
 0x537   : > { %v1232_v29 = vsub.f32 %v1199_v62, %v1218_v28 }
 0x539   : > { %v1244_v17 = vmul.f32 1.442695, %v1232_v29 }
 0x53b   : > { %3086 = vpow2.f32 %v1244_v17 }
 0x53c   : > { %3088 = vpow2.f32 %v1238_v30 }
 0x53e   : > { %1253 = vadd.xlane.f32.xlu1 %v1252_v32  ;;  %v1221_v33 = vpop.xlane.xlu2 %1220 }
 0x53f   : > { %v1233_v34 = vsub.f32 %v1200_v3, %v1221_v33 }
 0x541   : > { %v3783_v35 = vpop.eup %3086  ;;  %v1246_v36 = vmul.f32 1.442695, %v1233_v34 }
 0x542   : > { %v3785_v37 = vpop.eup %3088  ;;  %v1264_v38 = vsel %vm1203_vm9, %v3783_v35, 0.0 }
 0x543   : > { %1265 = vadd.xlane.f32.xlu2 %v1264_v38  ;;  %3090 = vpow2.f32 %v1246_v36  ;;  %v1255_v41 = vsel %vm1203_vm9, %v3785_v37, 0.0 }
 0x546   : > { %1256 = vadd.xlane.f32.xlu1 %v1255_v41 }
 0x549   : > { %v3791_v43 = vpop.eup %3090 }
 0x54a   : > { %v1267_v44 = vsel %vm1203_vm9, %v3791_v43, 0.0 }
 0x54e   : > { %1268 = vadd.xlane.f32.xlu1 %v1267_v44 }
 0x55b   : > { %v1224_v47 = vpop.xlane.xlu2 %1223 }
 0x55c   : > { %v1234_v48 = vsub.f32 %v1201_v6, %v1224_v47 }
 0x55e   : > { %v1248_v49 = vmul.f32 1.442695, %v1234_v48 }
 0x560   : > { %3092 = vpow2.f32 %v1248_v49 }
 0x563   : > { %v1227_v53 = vpop.xlane.xlu1 %1226 }
 0x564   : > { %v1235_v54 = vsub.f32 %v1202_v10, %v1227_v53 }
 0x566   : > { %v3796_v55 = vpop.eup %3092  ;;  %v1250_v58 = vmul.f32 1.442695, %v1235_v54 }
 0x567   : > { %v1270_v59 = vsel %vm1203_vm9, %v3796_v55, 0.0 }
 0x568   : > { %3094 = vpow2.f32 %v1250_v58  ;;  %1271 = vadd.xlane.f32.xlu1 %v1270_v59 }
 0x56c   : > { %1036 = vxpose.xlu2.c.b16.start.end [1/1] (short) %v1011_v60, 128 }
 0x56e   : > { %v3800_v61 = vpop.eup %3094 }
 0x56f   : > { %v1273_v62 = vsel %vm1203_vm9, %v3800_v61, 0.0 }
 0x570   : > { %1274 = vadd.xlane.f32.xlu1 %v1273_v62 }
 0x5a1   : > { %v3806_v3 = vpop.xlane.xlu2 %1259 }
 0x5a2   : > { %v1317_v57 = vand.u32 2147483648, %v3806_v3  ;;  %vm1311_vm6 = vweird.f32 %v3806_v3  ;;  %v1315_v58 = vand.u32 2147483647, %v3806_v3 }
 0x5a9   : > { %v3804_v63 = vpop.xlane.xlu1 %1262 }
 0x5aa   : > { %v1332_v53 = vand.u32 2147483648, %v3804_v63  ;;  %vm1326_vm4 = vweird.f32 %v3804_v63  ;;  %v1330_v56 = vand.u32 2147483647, %v3804_v63 }
 0x5ac   : > { %v1333_v60 = vor.u32 1.1754944e-38, %v1332_v53 }
 0x5b1   : > { %v1254_v1 = vpop.xlane.xlu1 %1253 }
 0x5b2   : > { %v1287_v19 = vand.u32 2147483648, %v1254_v1  ;;  %vm1281_vm14 = vweird.f32 %v1254_v1  ;;  %v1285_v15 = vand.u32 2147483647, %v1254_v1 }
 0x5b4   : > { %v1288_v24 = vor.u32 1.1754944e-38, %v1287_v19  ;;  %vm1286_vm1 = vcmp.eq.f32.partialorder %v1285_v15, 8.507059e+37 }
 0x5b6   : > { %v3808_v6 = vpop.xlane.xlu2 %1265 }
 0x5b9   : > { %v1257_v2 = vpop.xlane.xlu1 %1256 }
 0x5ba   : > { %3096 = vrcp.f32 %v1257_v2  ;;  %v1302_v14 = vand.u32 2147483648, %v1257_v2  ;;  %vm1296_vm12 = vweird.f32 %v1257_v2  ;;  %v1300_v18 = vand.u32 2147483647, %v1257_v2 }
 0x5bb   : > { %3098 = vrcp.f32 %v1254_v1 }
 0x5bc   : > { %v1303_v22 = vor.u32 1.1754944e-38, %v1302_v14  ;;  %vm1301_vm0 = vcmp.eq.f32.partialorder %v1300_v18, 8.507059e+37  ;;  %3100 = vrcp.f32 %v3804_v63 }
 0x5bd   : > { %3102 = vrcp.f32 %v3806_v3 }
 0x5c0   : > { %v3097_v4 = vpop.eup %3096 }
 0x5c1   : > { %v3099_v5 = vpop.eup %3098  ;;  %v1292_v42 = vmul.f32 %v3097_v4, %v1257_v2  ;;  %vm1297_vm10 = vweird.f32 %v3097_v4 }
 0x5c2   : > { %v1277_v7 = vmul.f32 %v3099_v5, %v1254_v1  ;;  %vm1282_vm11 = vweird.f32 %v3099_v5  ;;  %vm1298_vm13 = vmor %vm1296_vm12, %vm1297_vm10  ;;  %v3101_v36 = vpop.eup %3100  ;;  %vm1331_vm10 = vcmp.eq.f32.partialorder %v1330_v56, 8.507059e+37  ;;  %v1318_v1 = vor.u32 1.1754944e-38, %v1317_v57 }
 0x5c3   : > { %v1293_v8 = vsub.f32 1.0, %v1292_v42  ;;  %vm1283_vm15 = vmor %vm1281_vm14, %vm1282_vm11  ;;  %v3103_v41 = vpop.eup %3102  ;;  %v1322_v44 = vmul.f32 %v3101_v36, %v3804_v63  ;;  %vm1327_vm2 = vweird.f32 %v3101_v36  ;;  %vm1316_vm11 = vcmp.eq.f32.partialorder %v1315_v58, 8.507059e+37 }
 0x5c4   : > { %v1278_v9 = vsub.f32 1.0, %v1277_v7  ;;  %v1307_v47 = vmul.f32 %v3103_v41, %v3806_v3  ;;  %vm1312_vm3 = vweird.f32 %v3103_v41  ;;  %vm1328_vm5 = vmor %vm1326_vm4, %vm1327_vm2 }
 0x5c5   : > { %v1294_v10 = vmul.f32 %v3097_v4, %v1293_v8  ;;  %v1323_v48 = vsub.f32 1.0, %v1322_v44  ;;  %vm1313_vm7 = vmor %vm1311_vm6, %vm1312_vm3 }
 0x5c6   : > { %v1279_v12 = vmul.f32 %v3099_v5, %v1278_v9 }
 0x5c7   : > { %v1295_v13 = vadd.f32 %v3097_v4, %v1294_v10  ;;  %v1324_v49 = vmul.f32 %v3101_v36, %v1323_v48 }
 0x5c8   : > { %v1280_v16 = vadd.f32 %v3099_v5, %v1279_v12 }
 0x5c9   : > { %v1299_v21 = vsel %vm1298_vm13, %v3097_v4, %v1295_v13  ;;  %v1325_v52 = vadd.f32 %v3101_v36, %v1324_v49 }
 0x5ca   : > { %v1284_v23 = vsel %vm1283_vm15, %v3099_v5, %v1280_v16  ;;  %v1304_v26 = vsel %vm1301_vm0, %v1303_v22, %v1299_v21  ;;  %v1269_v5 = vpop.xlane.xlu1 %1268  ;;  %vm1341_vm0 = vweird.f32 %v3808_v6 }
 0x5cb   : > { %v1289_v29 = vsel %vm1286_vm1, %v1288_v24, %v1284_v23  ;;  %v1305_v30 = vmul.f32 %v3785_v37, %v1304_v26  ;;  %v1329_v59 = vsel %vm1328_vm5, %v3101_v36, %v1325_v52  ;;  %3104 = vrcp.f32 %v1269_v5 }
 0x5cc   : > { %v1290_v17 = vmul.f32 %v3779_v31, %v1289_v29  ;;  %v1308_v31 = vsub.f32 1.0, %v1307_v47  ;;  %v1334_v2 = vsel %vm1331_vm10, %v1333_v60, %v1329_v59  ;;  %3106 = vrcp.f32 %v3808_v6 }
 0x5cd   : > { %v1397_v33 = vpack.c.bf16 %v1305_v30, %v1305_v30  ;;  %v1335_v7 = vmul.f32 %v3775_v25, %v1334_v2  ;;  %v1362_v26 = vand.u32 2147483648, %v1269_v5  ;;  %vm1356_vm14 = vweird.f32 %v1269_v5 }
 0x5ce   : > { %v1396_v34 = vpack.c.bf16 %v1290_v17, %v1290_v17  ;;  %v1309_v51 = vmul.f32 %v3103_v41, %v1308_v31  ;;  %v1347_v29 = vand.u32 2147483648, %v3808_v6  ;;  %v1345_v30 = vand.u32 2147483647, %v3808_v6 }
 0x5cf   : > { %v1407_v38 = vunpack.c.l.b16 %v1397_v33  ;;  %v1399_v9 = vpack.c.bf16 %v1335_v7, %v1335_v7 }
 0x5d0   : > { %v1406_v46 = vunpack.c.l.b16 %v1396_v34  ;;  %v1310_v54 = vadd.f32 %v3103_v41, %v1309_v51  ;;  %v1348_v34 = vor.u32 1.1754944e-38, %v1347_v29  ;;  %vm1346_vm3 = vcmp.eq.f32.partialorder %v1345_v30, 8.507059e+37  ;;  %v2906_v29 = vld [vmem:[%s3641_s13 + $0x10] sm:$0xff] }
 0x5d1   : > { %v1435_v12 = vunpack.c.l.b16 %v1399_v9 }
 0x5d2   : > { %v1408_v37 = vpack.c.b16 %v1407_v38, %v1406_v46  ;;  %v1314_v62 = vsel %vm1313_vm7, %v3103_v41, %v1310_v54 }
 0x5d3   : > { %v1319_v63 = vsel %vm1316_vm11, %v1318_v1, %v1314_v62 }
 0x5d4   : > { %v1320_v8 = vmul.f32 %v3770_v20, %v1319_v63 }
 0x5d6   : > { %v1398_v10 = vpack.c.bf16 %v1320_v8, %v1320_v8 }
 0x5d8   : > { %v1434_v16 = vunpack.c.l.b16 %v1398_v10 }
 0x5da   : > { %v1436_v19 = vpack.c.b16 %v1435_v12, %v1434_v16 }
 0x5db   : > { %v3832_v23 = vpop.xlane.xlu1 %1271 }
 0x5dc   : > { %vm1371_vm10 = vweird.f32 %v3832_v23 }
 0x5e3   : > { %v1275_v41 = vpop.xlane.xlu1 %1274 }
 0x5e4   : > { %3108 = vrcp.f32 %v1275_v41  ;;  %v1392_v62 = vand.u32 2147483648, %v1275_v41  ;;  %vm1386_vm6 = vweird.f32 %v1275_v41  ;;  %v1390_v2 = vand.u32 2147483647, %v1275_v41 }
 0x5e5   : > { %3110 = vrcp.f32 %v3832_v23 }
 0x5e6   : > { %v1393_v63 = vor.u32 1.1754944e-38, %v1392_v62 }
 0x60d   : > { %v1044_v11 = vpop.trf.xlu2 }
 0x60e   : > { %v1413_v32 = vsel %vm1203_vm9, %v1044_v11, 0  ;;  %v3105_v11 = vpop.eup %3104 }
 0x60f   : > { %v3107_v13 = vpop.eup %3106  ;;  %v1352_v14 = vmul.f32 %v3105_v11, %v1269_v5  ;;  %vm1357_vm12 = vweird.f32 %v3105_v11 }
 0x610   : > { %v1337_v18 = vmul.f32 %v3107_v13, %v3808_v6  ;;  %vm1342_vm13 = vweird.f32 %v3107_v13  ;;  %vm1358_vm15 = vmor %vm1356_vm14, %vm1357_vm12  ;;  %v3109_v49 = vpop.eup %3108  ;;  %vm1391_vm12 = vcmp.eq.f32.partialorder %v1390_v2, 8.507059e+37  ;;  %v1682_v2 = vperm.slane %v3722_v45, 1 }
 0x611   : > { %v1353_v15 = vsub.f32 1.0, %v1352_v14  ;;  %vm1343_vm1 = vmor %vm1341_vm0, %vm1342_vm13  ;;  %v3111_v51 = vpop.eup %3110  ;;  %v1382_v53 = vmul.f32 %v3109_v49, %v1275_v41  ;;  %vm1387_vm4 = vweird.f32 %v3109_v49  ;;  %v2908_v41 = vld [vmem:[%s3641_s13 + $0x20] sm:$0xff] }
 0x612   : > { %v1338_v25 = vsub.f32 1.0, %v1337_v18  ;;  %v1367_v54 = vmul.f32 %v3111_v51, %v3832_v23  ;;  %vm1372_vm5 = vweird.f32 %v3111_v51  ;;  %vm1388_vm7 = vmor %vm1386_vm6, %vm1387_vm4 }
 0x613   : > { %v1354_v20 = vmul.f32 %v3105_v11, %v1353_v15  ;;  %v1383_v57 = vsub.f32 1.0, %v1382_v53  ;;  %vm1373_vm11 = vmor %vm1371_vm10, %vm1372_vm5 }
 0x614   : > { %v1339_v22 = vmul.f32 %v3107_v13, %v1338_v25 }
 0x615   : > { %v1355_v24 = vadd.f32 %v3105_v11, %v1354_v20  ;;  %v2905_v20 = vld [vmem:[%s3641_s13 + $0x8] sm:$0xff] }
 0x617   : > { %v1359_v17 = vsel %vm1358_vm15, %v3105_v11, %v1355_v24 }
 0x61d   : > { %v1045_v27 = vpop.trf.xlu2 }
 0x61e   : > { %v1416_v28 = vsel %vm1203_vm9, %v1045_v27, 0  ;;  %v1340_v27 = vadd.f32 %v3107_v13, %v1339_v22 }
 0x61f   : > { %1424 = vmatpush.bf16.xpose.msrb.mxu1 %v1416_v28  ;;  %v1360_v28 = vand.u32 2147483647, %v1269_v5  ;;  %v1375_v5 = vand.u32 2147483647, %v3832_v23 }
 0x620   : > { %v1344_v33 = vsel %vm1343_vm1, %v3107_v13, %v1340_v27 }
 0x621   : > { %vm1361_vm2 = vcmp.eq.f32.partialorder %v1360_v28, 8.507059e+37  ;;  %v1349_v46 = vsel %vm1346_vm3, %v1348_v34, %v1344_v33  ;;  %vm1376_vm13 = vcmp.eq.f32.partialorder %v1375_v5, 8.507059e+37  ;;  %v2907_v28 = vld [vmem:[%s3641_s13 + $0x18] sm:$0xff] }
 0x627   : > { %1425 = vmatpush.bf16.xpose.msrb.mxu1 %v1413_v32  ;;  %v1363_v32 = vor.u32 1.1754944e-38, %v1362_v26 }
 0x629   : > { %v1364_v36 = vsel %vm1361_vm2, %v1363_v32, %v1359_v17  ;;  %v2909_v32 = vld [vmem:[%s3641_s13 + $0x28] sm:$0xff] }
 0x62a   : > { %v1365_v47 = vmul.f32 %v3791_v43, %v1364_v36  ;;  %v1368_v43 = vsub.f32 1.0, %v1367_v54 }
 0x62c   : > { %v1401_v6 = vpack.c.bf16 %v1365_v47, %v1365_v47  ;;  %v1369_v59 = vmul.f32 %v3111_v51, %v1368_v43 }
 0x62d   : > { %v1046_v50 = vpop.trf.xlu2 }
 0x62e   : > { %2636 = vmatmul.msk.bf16.vlgmr.msrb.gmra.mxu1 %vm1203_vm9, %v1408_v37  ;;  %v1441_v3 = vsel %vm1203_vm9, %v1046_v50, 0  ;;  %v1350_v37 = vmul.f32 %v3783_v35, %v1349_v46  ;;  %v1463_v50 = vunpack.c.l.b16 %v1401_v6  ;;  %v1384_v35 = vmul.f32 %v3109_v49, %v1383_v57  ;;  %v2911_v46 = vld [vmem:[%s3641_s13 + $0x38] sm:$0xff] }
 0x62f   : > { %v1370_v1 = vadd.f32 %v3111_v51, %v1369_v59  ;;  %1566 = vmatpush.bf16.msra.mxu1 %v2905_v20 }
 0x630   : > { %v1400_v31 = vpack.c.bf16 %v1350_v37, %v1350_v37  ;;  %v1385_v60 = vadd.f32 %v3109_v49, %v1384_v35  ;;  %v2910_v37 = vld [vmem:[%s3641_s13 + $0x30] sm:$0xff] }
 0x631   : > { %v1374_v7 = vsel %vm1373_vm11, %v3111_v51, %v1370_v1 }
 0x632   : > { %v1462_v52 = vunpack.c.l.b16 %v1400_v31 }
 0x634   : > { %v1464_v56 = vpack.c.b16 %v1463_v50, %v1462_v52 }
 0x63d   : > { %v1047_v4 = vpop.trf.xlu2 }
 0x63e   : > { %v1444_v42 = vsel %vm1203_vm9, %v1047_v4, 0  ;;  %v1377_v4 = vand.u32 2147483648, %v3832_v23 }
 0x63f   : > { %1452 = vmatpush.bf16.xpose.msrb.mxu2 %v1444_v42  ;;  %v1389_v42 = vsel %vm1388_vm7, %v3109_v49, %v1385_v60 }
 0x640   : > { %v1378_v8 = vor.u32 1.1754944e-38, %v1377_v4 }
 0x642   : > { %v1379_v11 = vsel %vm1376_vm13, %v1378_v8, %v1374_v7 }
 0x643   : > { %v1380_v13 = vmul.f32 %v3796_v55, %v1379_v11 }
 0x645   : > { %v1402_v16 = vpack.c.bf16 %v1380_v13, %v1380_v13 }
 0x647   : > { %1453 = vmatpush.bf16.xpose.msrb.mxu2 %v1441_v3  ;;  %v1394_v3 = vsel %vm1391_vm12, %v1393_v63, %v1389_v42  ;;  %v1490_v15 = vunpack.c.l.b16 %v1402_v16  ;;  %v3416_v16 = vmov 128.0  }
 0x648   : > { %v1395_v12 = vmul.f32 %v3800_v61, %v1394_v3  ;;  %3112 = vrcp.f32 %v3416_v16 }
 0x64a   : > { %v1403_v14 = vpack.c.bf16 %v1395_v12, %v1395_v12 }
 0x64d   : > { %v1048_v21 = vpop.trf.xlu2 }
 0x64e   : > { %2637 = vmatmul.msk.bf16.vlgmr.msrb.gmra.mxu2 %vm1203_vm9, %v1436_v19  ;;  %v1469_v48 = vsel %vm1203_vm9, %v1048_v21, 0  ;;  %v1491_v19 = vunpack.c.l.b16 %v1403_v14  ;;  %v2904_v21 = vld [vmem:[%s3641_s13] sm:$0xff]  ;;  %v3113_v45 = vpop.eup %3112 }
 0x64f   : > { %1567 = vmatpush.bf16.msra.mxu1 %v2904_v21  ;;  %1600 = vmatpush.bf16.msra.mxu2 %v2907_v28  ;;  %v2926_v28 = vld [vmem:[%s3643_s10 + $0x74] sm:$0xf] }
 0x650   : > { %v1492_v25 = vpack.c.b16 %v1491_v19, %v1490_v15 }
 0x653   : > { %1601 = vmatpush.bf16.msra.mxu2 %v2906_v29 }
 0x65d   : > { %v1049_v38 = vpop.trf.xlu2 }
 0x65e   : > { %v1472_v44 = vsel %vm1203_vm9, %v1049_v38, 0 }
 0x65f   : > { %1480 = vmatpush.bf16.xpose.msrb.mxu3 %v1472_v44 }
 0x667   : > { %1481 = vmatpush.bf16.xpose.msrb.mxu3 %v1469_v48 }
 0x66d   : > { %v1050_v58 = vpop.trf.xlu2 }
 0x66e   : > { %2638 = vmatmul.msk.bf16.vlgmr.msrb.gmra.mxu3 %vm1203_vm9, %v1464_v56  ;;  %v1497_v18 = vsel %vm1203_vm9, %v1050_v58, 0 }
 0x66f   : > { %1634 = vmatpush.bf16.msra.mxu3 %v2909_v32  ;;  %v2726_v32 = vld [vmem:[%s3643_s10 + $0x60] sm:$0xf] }
 0x673   : > { %1635 = vmatpush.bf16.msra.mxu3 %v2908_v41 }
 0x67d   : > { %v1051_v9 = vpop.trf.xlu2 }
 0x67e   : > { %v1500_v10 = vsel %vm1203_vm9, %v1051_v9, 0 }
 0x67f   : > { %1508 = vmatpush.bf16.xpose.msra.mxu0 %v1500_v10 }
 0x687   : > { %1509 = vmatpush.bf16.xpose.msra.mxu0 %v1497_v18  ;;  %v1692_v18 = vmul.f32 128.0, %v3113_v45 }
 0x689   : > { %v1693_v19 = vsub.f32 1.0, %v1692_v18 }
 0x68b   : > { %v1694_v15 = vmul.f32 %v3113_v45, %v1693_v19 }
 0x68e   : > { %2639 = vmatmul.msk.bf16.vlgmr.msra.gmra.mxu0 %vm1203_vm9, %v1492_v25  ;;  %v1695_v25 = vadd.f32 %v3113_v45, %v1694_v15 }
 0x68f   : > { %1668 = vmatpush.bf16.msrb.mxu0 %v2911_v46  ;;  %v2923_v46 = vld [vmem:[%s3643_s10 + $0x54] sm:$0xf0] }
 0x693   : > { %1669 = vmatpush.bf16.msrb.mxu0 %v2910_v37 }
 0x6ab   : > { %v1427_v61 = vpop.f32.mrf.mxu1 }
 0x6ac   : > { %v1532_v22 = vpack.c.bf16 %v1427_v61, %v1427_v61 }
 0x6ae   : > { %v1542_v24 = vunpack.c.l.b16 %v1532_v22 }
 0x6b3   : > { %v1429_v55 = vpop.f32.mrf.mxu1 }
 0x6b4   : > { %v1533_v23 = vpack.c.bf16 %v1429_v55, %v1429_v55 }
 0x6b6   : > { %v1543_v26 = vunpack.c.l.b16 %v1533_v23 }
 0x6b8   : > { %v1544_v27 = vpack.c.b16 %v1543_v26, %v1542_v24  ;;  %v2734_v26 = vld [vmem:[%s3643_s10 + $0x70] sm:$0xf] }
 0x6ba   : > { %2648 = vmatmul.msk.bf16.vlgmr.msra.gmra.mxu1 %vm1116_vm8, %v1544_v27  ;;  %v2927_v27 = vld [vmem:[%s3643_s10 + $0x74] sm:$0xf0] }
 0x6bb   : > { %v2735_v29 = vor.u32 %v2927_v27, %v2734_v26 }
 0x6bd   : > { %1839 = vmatpush.bf16.msrb.mxu1 %v2735_v29 }
 0x6d1   : > { %v1455_v30 = vpop.f32.mrf.mxu2 }
 0x6d2   : > { %v1534_v17 = vpack.c.bf16 %v1455_v30, %v1455_v30  ;;  %v2736_v30 = vld [vmem:[%s3643_s10 + $0x78] sm:$0xf0] }
 0x6d4   : > { %v1576_v36 = vunpack.c.l.b16 %v1534_v17  ;;  %v2739_v17 = vor.u32 %v2926_v28, %v2736_v30 }
 0x6d6   : > { %1853 = vmatpush.bf16.msrb.mxu2 %v2739_v17 }
 0x6d9   : > { %v1457_v33 = vpop.f32.mrf.mxu2 }
 0x6da   : > { %v1535_v34 = vpack.c.bf16 %v1457_v33, %v1457_v33  ;;  %v2925_v33 = vld [vmem:[%s3643_s10 + $0x64] sm:$0xf0] }
 0x6dc   : > { %v1577_v38 = vunpack.c.l.b16 %v1535_v34  ;;  %v2924_v34 = vld [vmem:[%s3643_s10 + $0x64] sm:$0xf] }
 0x6de   : > { %v1578_v44 = vpack.c.b16 %v1577_v38, %v1576_v36  ;;  %v2727_v36 = vor.u32 %v2925_v33, %v2726_v32  ;;  %v2728_v38 = vld [vmem:[%s3643_s10 + $0x68] sm:$0xf0]  ;;  %v3915_v33 = vld [vmem:[%s3660_s4] sm:$0xff] }
 0x6df   : > { %v2731_v41 = vor.u32 %v2924_v34, %v2728_v38  ;;  %v1734_v34 = vperm.slane %v3915_v33, 4 }
 0x6e0   : > { %2657 = vmatmul.msk.bf16.vlgmr.msra.gmra.mxu2 %vm1116_vm8, %v1578_v44  ;;  %1840 = vmatpush.bf16.msrb.mxu1 %v2727_v36  ;;  %v2718_v44 = vld [vmem:[%s3643_s10 + $0x50] sm:$0xf] }
 0x6e1   : > { %1854 = vmatpush.bf16.msrb.mxu2 %v2731_v41  ;;  %v2719_v37 = vor.u32 %v2923_v46, %v2718_v44  ;;  %v1737_v46 = vperm.slane %v3915_v33, 5 }
 0x6e4   : > { %1841 = vmatpush.bf16.msrb.mxu1 %v2719_v37 }
 0x6f1   : > { %v1483_v47 = vpop.f32.mrf.mxu3 }
 0x6f2   : > { %v1536_v6 = vpack.c.bf16 %v1483_v47, %v1483_v47  ;;  %v2922_v47 = vld [vmem:[%s3643_s10 + $0x54] sm:$0xf] }
 0x6f4   : > { %v1610_v49 = vunpack.c.l.b16 %v1536_v6  ;;  %v2720_v6 = vld [vmem:[%s3643_s10 + $0x58] sm:$0xf0] }
 0x6f9   : > { %v1485_v48 = vpop.f32.mrf.mxu3 }
 0x6fa   : > { %v1537_v31 = vpack.c.bf16 %v1485_v48, %v1485_v48  ;;  %v2723_v48 = vor.u32 %v2922_v47, %v2720_v6 }
 0x6fc   : > { %v1611_v50 = vunpack.c.l.b16 %v1537_v31  ;;  %1855 = vmatpush.bf16.msrb.mxu2 %v2723_v48  ;;  %v2710_v31 = vld [vmem:[%s3643_s10 + $0x40] sm:$0xf]  ;;  %v2935_v48 = vld [vmem:[%s3649_s14 + $0x38] sm:$0xff] }
 0x6fd   : > { %2034 = vmatpush.bf16.msrb.mxu3 %v2935_v48 }
 0x6fe   : > { %v1612_v51 = vpack.c.b16 %v1611_v50, %v1610_v49  ;;  %v2921_v49 = vld [vmem:[%s3643_s10 + $0x44] sm:$0xf0]  ;;  %v2920_v50 = vld [vmem:[%s3643_s10 + $0x44] sm:$0xf] }
 0x700   : > { %2666 = vmatmul.msk.bf16.vlgmr.msra.gmra.mxu3 %vm1116_vm8, %v1612_v51  ;;  %v2711_v51 = vor.u32 %v2921_v49, %v2710_v31  ;;  %v2943_v31 = vld [vmem:[%s3649_s14 + $0x78] sm:$0xff]  ;;  %v2933_v49 = vld [vmem:[%s3649_s14 + $0x28] sm:$0xff] }
 0x701   : > { %2048 = vmatpush.bf16.msra.mxu0 %v2943_v31 }
 0x702   : > { %1842 = vmatpush.bf16.msrb.mxu1 %v2711_v51  ;;  %v2932_v51 = vld [vmem:[%s3649_s14 + $0x20] sm:$0xff] }
 0x70b   : > { %v1511_v52 = vpop.f32.mrf.mxu0 }
 0x70c   : > { %v1538_v53 = vpack.c.bf16 %v1511_v52, %v1511_v52  ;;  %v2712_v52 = vld [vmem:[%s3643_s10 + $0x48] sm:$0xf0] }
 0x70e   : > { %v1644_v57 = vunpack.c.l.b16 %v1538_v53  ;;  %v2715_v53 = vor.u32 %v2920_v50, %v2712_v52  ;;  %v2942_v50 = vld [vmem:[%s3649_s14 + $0x70] sm:$0xff]  ;;  %v2941_v52 = vld [vmem:[%s3649_s14 + $0x68] sm:$0xff] }
 0x70f   : > { %2049 = vmatpush.bf16.msra.mxu0 %v2942_v50 }
 0x710   : > { %1856 = vmatpush.bf16.msrb.mxu2 %v2715_v53  ;;  %v2931_v53 = vld [vmem:[%s3649_s14 + $0x18] sm:$0xff] }
 0x713   : > { %v1513_v54 = vpop.f32.mrf.mxu0  ;;  %2050 = vmatpush.bf16.msra.mxu0 %v2941_v52  ;;  %v1937_v52 = vperm.slane %v3915_v33, 3 }
 0x714   : > { %v1539_v56 = vpack.c.bf16 %v1513_v54, %v1513_v54  ;;  %v2702_v54 = vld [vmem:[%s3643_s10 + $0x30] sm:$0xf] }
 0x716   : > { %v1645_v43 = vunpack.c.l.b16 %v1539_v56  ;;  %v2919_v56 = vld [vmem:[%s3643_s10 + $0x34] sm:$0xf0] }
 0x718   : > { %v1646_v35 = vpack.c.b16 %v1645_v43, %v1644_v57  ;;  %v2918_v57 = vld [vmem:[%s3643_s10 + $0x34] sm:$0xf]  ;;  %v2703_v43 = vor.u32 %v2919_v56, %v2702_v54  ;;  %v2940_v54 = vld [vmem:[%s3649_s14 + $0x60] sm:$0xff] }
 0x719   : > { %2051 = vmatpush.bf16.msra.mxu0 %v2940_v54  ;;  %v2930_v56 = vld [vmem:[%s3649_s14 + $0x10] sm:$0xff] }
 0x71a   : > { %2675 = vmatmul.msk.bf16.vlgmr.msrb.gmra.mxu0 %vm1116_vm8, %v1646_v35  ;;  %vm1696_vm8 = vweird.f32 %v3113_v45  ;;  %v2704_v35 = vld [vmem:[%s3643_s10 + $0x38] sm:$0xf0]  ;;  %1843 = vmatpush.bf16.msrb.mxu1 %v2703_v43  ;;  %v2929_v43 = vld [vmem:[%s3649_s14 + $0x8] sm:$0xff] }
 0x737   : > { %v1569_v59 = vpop.f32.mrf.mxu1 }
 0x73f   : > { %v1571_v7 = vpop.f32.mrf.mxu1 }
 0x763   : > { %v1603_v58 = vpop.f32.mrf.mxu2 }
 0x764   : > { %v1676_v62 = vadd.f32 %v1603_v58, %v1569_v59  ;;  %v2707_v58 = vor.u32 %v2918_v57, %v2704_v35  ;;  %v2694_v59 = vld [vmem:[%s3643_s10 + $0x20] sm:$0xf]  ;;  %v2939_v57 = vld [vmem:[%s3649_s14 + $0x58] sm:$0xff]  ;;  %v1757_v35 = vperm.slane %v3915_v33, 2 }
 0x765   : > { %2052 = vmatpush.bf16.msra.mxu0 %v2939_v57 }
 0x766   : > { %1857 = vmatpush.bf16.msrb.mxu2 %v2707_v58  ;;  %v2938_v58 = vld [vmem:[%s3649_s14 + $0x50] sm:$0xff] }
 0x769   : > { %2053 = vmatpush.bf16.msra.mxu0 %v2938_v58 }
 0x76b   : > { %v1605_v42 = vpop.f32.mrf.mxu2 }
 0x76c   : > { %v1679_v3 = vadd.f32 %v1605_v42, %v1571_v7  ;;  %v2915_v42 = vld [vmem:[%s3643_s10 + $0x14] sm:$0xf0] }
 0x783   : > { %v1637_v60 = vpop.f32.mrf.mxu3 }
 0x784   : > { %v1677_v1 = vadd.f32 %v1676_v62, %v1637_v60  ;;  %v2917_v60 = vld [vmem:[%s3643_s10 + $0x24] sm:$0xf0]  ;;  %v2916_v62 = vld [vmem:[%s3643_s10 + $0x24] sm:$0xf] }
 0x78b   : > { %v1639_v8 = vpop.f32.mrf.mxu3 }
 0x78c   : > { %v1680_v10 = vadd.f32 %v1679_v3, %v1639_v8  ;;  %v2688_v8 = vld [vmem:[%s3643_s10 + $0x18] sm:$0xf0]  ;;  %v2678_v3 = vld [vmem:[%s3643_s10] sm:$0xf] }
 0x797   : > { %v1671_v4 = vpop.f32.mrf.mxu0 }
 0x798   : > { %v1678_v5 = vadd.f32 %v1677_v1, %v1671_v4  ;;  %v2695_v1 = vor.u32 %v2917_v60, %v2694_v59  ;;  %v2928_v60 = vld [vmem:[%s3649_s14] sm:$0xff] }
 0x79a   : > { %v1683_v63 = vadd.f32 %v1682_v2, %v1678_v5  ;;  %1844 = vmatpush.bf16.msrb.mxu1 %v2695_v1  ;;  %v2686_v5 = vld [vmem:[%s3643_s10 + $0x10] sm:$0xf]  ;;  %v2937_v1 = vld [vmem:[%s3649_s14 + $0x48] sm:$0xff] }
 0x79b   : > { %v2687_v7 = vor.u32 %v2915_v42, %v2686_v5  ;;  %2054 = vmatpush.bf16.msra.mxu0 %v2937_v1 }
 0x79c   : > { %v1685_v9 = vadd.f32 %v1683_v63, %v3711_v39  ;;  %v3867_v39 = vsel %vm1696_vm8, %v3113_v45, %v1695_v25  ;;  %v2914_v63 = vld [vmem:[%s3643_s10 + $0x14] sm:$0xf] }
 0x79e   : > { %1687 = vadd.xlane.f32.xlu1 %v1685_v9  ;;  %1845 = vmatpush.bf16.msrb.mxu1 %v2687_v7  ;;  %v2936_v7 = vld [vmem:[%s3649_s14 + $0x40] sm:$0xff] }
 0x79f   : > { %v1673_v11 = vpop.f32.mrf.mxu0  ;;  %2055 = vmatpush.bf16.msra.mxu0 %v2936_v7 }
 0x7a0   : > { %v1681_v12 = vadd.f32 %v1680_v10, %v1673_v11  ;;  %v2691_v11 = vor.u32 %v2914_v63, %v2688_v8 }
 0x7a2   : > { %v1684_v13 = vadd.f32 %v1682_v2, %v1681_v12  ;;  %v2696_v2 = vld [vmem:[%s3643_s10 + $0x28] sm:$0xf0]  ;;  %v2912_v12 = vld [vmem:[%s3643_s10 + $0x4] sm:$0xf] }
 0x7a3   : > { %v2699_v4 = vor.u32 %v2916_v62, %v2696_v2 }
 0x7a4   : > { %v1686_v14 = vadd.f32 %v1684_v13, %v3713_v40  ;;  %v2680_v13 = vld [vmem:[%s3643_s10 + $0x8] sm:$0xf0] }
 0x7a5   : > { %1858 = vmatpush.bf16.msrb.mxu2 %v2699_v4  ;;  %v2683_v45 = vor.u32 %v2912_v12, %v2680_v13  ;;  %v3131_v4 = vld [vmem:[%s3660_s4 + $0x8] sm:$0xff] }
 0x7a6   : > { %1689 = vadd.xlane.f32.xlu2 %v1686_v14  ;;  %v1758_v5 = vperm.slane %v3131_v4, 2 }
 0x7a9   : > { %1859 = vmatpush.bf16.msrb.mxu2 %v2691_v11 }
 0x7ad   : > { %1860 = vmatpush.bf16.msrb.mxu2 %v2683_v45 }
 0x811   : > { %v1688_v20 = vpop.xlane.xlu1 %1687 }
 0x812   : > { %v1698_v21 = vmul.f32 %v3867_v39, %v1688_v20 }
 0x814   : > { %v3870_v61 = vsub.f32 %v1685_v9, %v1698_v21  ;;  %v2913_v9 = vld [vmem:[%s3643_s10 + $0x4] sm:$0xf0] }
 0x815   : > { %v2679_v16 = vor.u32 %v2913_v9, %v2678_v3 }
 0x816   : > { %v1702_v40 = vmul.f32 %v3870_v61, %v3870_v61 }
 0x817   : > { %1846 = vmatpush.bf16.msrb.mxu1 %v2679_v16 }
 0x818   : > { %1704 = vadd.xlane.f32.xlu1 %v1702_v40 }
 0x819   : > { %v1690_v22 = vpop.xlane.xlu2 %1689 }
 0x81a   : > { %v1699_v55 = vmul.f32 %v3867_v39, %v1690_v22 }
 0x81c   : > { %v3875_v23 = vsub.f32 %v1686_v14, %v1699_v55 }
 0x81e   : > { %v1703_v24 = vmul.f32 %v3875_v23, %v3875_v23 }
 0x820   : > { %1706 = vadd.xlane.f32.xlu1 %v1703_v24 }
 0x88b   : > { %v1705_v10 = vpop.xlane.xlu1 %1704 }
 0x88c   : > { %v1708_v14 = vmul.f32 %v1705_v10, %v3867_v39 }
 0x88e   : > { %v1710_v18 = vadd.f32 1e-12, %v1708_v14 }
 0x890   : > { %3114 = vrsqrt.f32 %v1710_v18  ;;  %vm1718_vm14 = vweird.f32 %v1710_v18 }
 0x893   : > { %v1707_v19 = vpop.xlane.xlu1 %1706 }
 0x894   : > { %v1709_v15 = vmul.f32 %v1707_v19, %v3867_v39 }
 0x896   : > { %v3115_v25 = vpop.eup %3114  ;;  %v1711_v20 = vadd.f32 1e-12, %v1709_v15 }
 0x897   : > { %v1713_v21 = vmul.f32 %v3115_v25, %v1710_v18  ;;  %vm1719_vm9 = vweird.f32 %v3115_v25 }
 0x898   : > { %3116 = vrsqrt.f32 %v1711_v20  ;;  %vm1720_vm15 = vmor %vm1718_vm14, %vm1719_vm9  ;;  %vm1728_vm1 = vweird.f32 %v1711_v20 }
 0x899   : > { %v1714_v40 = vmul.f32 %v3115_v25, %v1713_v21 }
 0x89b   : > { %v1715_v22 = vmul.f32 0.5, %v1714_v40 }
 0x89d   : > { %v1716_v55 = vsub.f32 1.5, %v1715_v22 }
 0x89e   : > { %v3117_v24 = vpop.eup %3116 }
 0x89f   : > { %v1717_v26 = vmul.f32 %v3115_v25, %v1716_v55  ;;  %v1723_v27 = vmul.f32 %v3117_v24, %v1711_v20  ;;  %vm1729_vm0 = vweird.f32 %v3117_v24 }
 0x8a0   : > { %vm1730_vm2 = vmor %vm1728_vm1, %vm1729_vm0 }
 0x8a1   : > { %v1724_v28 = vmul.f32 %v3117_v24, %v1723_v27  ;;  %v1721_v29 = vsel %vm1720_vm15, %v3115_v25, %v1717_v26 }
 0x8a2   : > { %v1732_v32 = vmul.f32 %v1721_v29, %v3870_v61 }
 0x8a3   : > { %v1725_v30 = vmul.f32 0.5, %v1724_v28 }
 0x8a4   : > { %v1735_v44 = vmul.f32 %v1734_v34, %v1732_v32 }
 0x8a5   : > { %v1726_v17 = vsub.f32 1.5, %v1725_v30 }
 0x8a6   : > { %v3920_v61 = vadd.f32 %v1737_v46, %v1735_v44 }
 0x8a7   : > { %v1727_v36 = vmul.f32 %v3117_v24, %v1726_v17 }
 0x8a9   : > { %v1731_v38 = vsel %vm1730_vm2, %v3117_v24, %v1727_v36 }
 0x8aa   : > { %v1733_v41 = vmul.f32 %v1731_v38, %v3875_v23  ;;  %v2934_v23 = vld [vmem:[%s3649_s14 + $0x30] sm:$0xff]  ;;  %s4039_s14 = sld [smem:[#allocation31_spill]] (!%p2804_p1) }
 0x8ab   : > { %2035 = vmatpush.bf16.msrb.mxu3 %v2934_v23 }
 0x8ac   : > { %v1736_v47 = vmul.f32 %v1734_v34, %v1733_v41 }
 0x8ae   : > { %v3922_v37 = vadd.f32 %v1737_v46, %v1736_v47 }
 0x8af   : > { %2036 = vmatpush.bf16.msrb.mxu3 %v2933_v49 }
 0x8b0   : > { %v1740_v6 = vpack.c.bf16 %v3922_v37, %v3920_v61 }
 0x8b2   : > { %1847 = vmatmul.bf16.vlgmr.msrb.gmra.mxu1 %v1740_v6  ;;  %1861 = vmatmul.bf16.vlgmr.msrb.gmra.mxu2 %v1740_v6 }
 0x8b3   : > { %2037 = vmatpush.bf16.msrb.mxu3 %v2932_v51 }
 0x8b7   : > { %2038 = vmatpush.bf16.msrb.mxu3 %v2931_v53 }
 0x8bb   : > { %2039 = vmatpush.bf16.msrb.mxu3 %v2930_v56 }
 0x8bf   : > { %2040 = vmatpush.bf16.msrb.mxu3 %v2929_v43 }
 0x8c3   : > { %2041 = vmatpush.bf16.msrb.mxu3 %v2928_v60 }
 0x92f   : > { %v1848_v59 = vpop.f32.mrf.mxu1 }
 0x930   : > { %v1849_v62 = vadd.f32 %v1848_v59, %v1757_v35 }
 0x932   : > { %v1867_v2 = vmul.f32 %v1849_v62, %v1849_v62 }
 0x934   : > { %v1871_v42 = vmul.f32 %v1867_v2, %v1849_v62 }
 0x935   : > { %v1862_v63 = vpop.f32.mrf.mxu2 }
 0x936   : > { %v1875_v8 = vmul.f32 0.044715, %v1871_v42  ;;  %v1863_v3 = vadd.f32 %v1862_v63, %v1758_v5 }
 0x937   : > { %v1850_v9 = vpop.f32.mrf.mxu1 }
 0x938   : > { %v1879_v10 = vadd.f32 %v1875_v8, %v1849_v62  ;;  %v1868_v11 = vmul.f32 %v1863_v3, %v1863_v3  ;;  %v1851_v12 = vadd.f32 %v1850_v9, %v1757_v35 }
 0x93a   : > { %v1883_v13 = vmul.f32 0.7978846, %v1879_v10  ;;  %v1872_v14 = vmul.f32 %v1868_v11, %v1863_v3  ;;  %v1869_v16 = vmul.f32 %v1851_v12, %v1851_v12 }
 0x93c   : > { %v1876_v45 = vmul.f32 0.044715, %v1872_v14  ;;  %v1873_v18 = vmul.f32 %v1869_v16, %v1851_v12  ;;  %3118 = vtanh.f32 %v1883_v13 }
 0x93d   : > { %v1864_v19 = vpop.f32.mrf.mxu2 }
 0x93e   : > { %v1880_v15 = vadd.f32 %v1876_v45, %v1863_v3  ;;  %v1877_v25 = vmul.f32 0.044715, %v1873_v18  ;;  %v1865_v20 = vadd.f32 %v1864_v19, %v1758_v5 }
 0x940   : > { %v1884_v21 = vmul.f32 0.7978846, %v1880_v15  ;;  %v1881_v40 = vadd.f32 %v1877_v25, %v1851_v12  ;;  %v1870_v22 = vmul.f32 %v1865_v20, %v1865_v20  ;;  %v2104_v25 = vperm.slane %v3915_v33, 6 }
 0x942   : > { %v1885_v55 = vmul.f32 0.7978846, %v1881_v40  ;;  %v1874_v24 = vmul.f32 %v1870_v22, %v1865_v20  ;;  %3120 = vtanh.f32 %v1884_v21  ;;  %v3119_v26 = vpop.eup %3118  ;;  %v2107_v40 = vperm.slane %v3915_v33, 7 }
 0x943   : > { %v1891_v29 = vadd.f32 1.0, %v3119_v26 }
 0x944   : > { %3122 = vtanh.f32 %v1885_v55  ;;  %v1878_v27 = vmul.f32 0.044715, %v1874_v24 }
 0x945   : > { %v1895_v34 = vmul.f32 0.5, %v1891_v29 }
 0x946   : > { %v1882_v28 = vadd.f32 %v1878_v27, %v1865_v20 }
 0x947   : > { %v1899_v44 = vmul.f32 %v1895_v34, %v1849_v62 }
 0x948   : > { %v1886_v30 = vmul.f32 0.7978846, %v1882_v28  ;;  %v3121_v17 = vpop.eup %3120 }
 0x949   : > { %v1892_v38 = vadd.f32 1.0, %v3121_v17 }
 0x94a   : > { %v3123_v32 = vpop.eup %3122  ;;  %3124 = vtanh.f32 %v1886_v30 }
 0x94b   : > { %v1893_v36 = vadd.f32 1.0, %v3123_v32  ;;  %v1896_v6 = vmul.f32 0.5, %v1892_v38 }
 0x94d   : > { %v1897_v41 = vmul.f32 0.5, %v1893_v36  ;;  %v1900_v49 = vmul.f32 %v1896_v6, %v1863_v3 }
 0x94f   : > { %v1901_v46 = vmul.f32 %v1897_v41, %v1851_v12 }
 0x950   : > { %v3125_v47 = vpop.eup %3124 }
 0x951   : > { %v1894_v48 = vadd.f32 1.0, %v3125_v47  ;;  %v1903_v23 = vpack.c.bf16 %v1901_v46, %v1899_v44 }
 0x953   : > { %v1898_v31 = vmul.f32 0.5, %v1894_v48  ;;  %2042 = vmatmul.bf16.vlgmr.msrb.gmra.mxu3 %v1903_v23 }
 0x955   : > { %v1902_v50 = vmul.f32 %v1898_v31, %v1865_v20 }
 0x957   : > { %v1904_v51 = vpack.c.bf16 %v1902_v50, %v1900_v49 }
 0x959   : > { %2056 = vmatmul.bf16.vlgmr.msra.gmra.mxu0 %v1904_v51 }
 0x9d6   : > { %v2043_v53 = vpop.f32.mrf.mxu3  ;;  %v2057_v54 = vpop.f32.mrf.mxu0 }
 0x9d7   : > { %v2044_v56 = vadd.f32 %v2043_v53, %v1937_v52 }
 0x9d9   : > { %v2058_v57 = vadd.f32 %v2057_v54, %v2044_v56 }
 0x9db   : > { %v2062_v43 = vadd.f32 %v2058_v57, %v3920_v61 }
 0x9dd   : > { %2064 = vadd.xlane.f32.xlu1 %v2062_v43 }
 0x9de   : > { %v2045_v35 = vpop.f32.mrf.mxu3  ;;  %v2059_v59 = vpop.f32.mrf.mxu0 }
 0x9df   : > { %v2046_v58 = vadd.f32 %v2045_v35, %v1937_v52 }
 0x9e1   : > { %v2060_v60 = vadd.f32 %v2059_v59, %v2046_v58 }
 0x9e3   : > { %v2063_v62 = vadd.f32 %v2060_v60, %v3922_v37 }
 0x9e5   : > { %2066 = vadd.xlane.f32.xlu1 %v2063_v62 }
 0xa50   : > { %v2065_v1 = vpop.xlane.xlu1 %2064 }
 0xa51   : > { %v2068_v2 = vmul.f32 %v2065_v1, %v3867_v39 }
 0xa53   : > { %v2070_v4 = vsub.f32 %v2062_v43, %v2068_v2 }
 0xa55   : > { %v2072_v5 = vmul.f32 %v2070_v4, %v2070_v4 }
 0xa57   : > { %2074 = vadd.xlane.f32.xlu1 %v2072_v5 }
 0xa58   : > { %v2067_v42 = vpop.xlane.xlu1 %2066 }
 0xa59   : > { %v2069_v63 = vmul.f32 %v2067_v42, %v3867_v39 }
 0xa5b   : > { %v2071_v7 = vsub.f32 %v2063_v62, %v2069_v63 }
 0xa5d   : > { %v2073_v8 = vmul.f32 %v2071_v7, %v2071_v7 }
 0xa5f   : > { %2076 = vadd.xlane.f32.xlu1 %v2073_v8 }
 0xaca   : > { %v2075_v61 = vpop.xlane.xlu1 %2074 }
 0xacb   : > { %v2078_v3 = vmul.f32 %v2075_v61, %v3867_v39 }
 0xacd   : > { %v2080_v9 = vadd.f32 1e-12, %v2078_v3 }
 0xacf   : > { %3126 = vrsqrt.f32 %v2080_v9  ;;  %vm2088_vm4 = vweird.f32 %v2080_v9 }
 0xad2   : > { %v2077_v10 = vpop.xlane.xlu1 %2076 }
 0xad3   : > { %v2079_v37 = vmul.f32 %v2077_v10, %v3867_v39 }
 0xad5   : > { %v3127_v11 = vpop.eup %3126  ;;  %v2081_v12 = vadd.f32 1e-12, %v2079_v37 }
 0xad6   : > { %v2083_v13 = vmul.f32 %v3127_v11, %v2080_v9  ;;  %vm2089_vm3 = vweird.f32 %v3127_v11 }
 0xad7   : > { %3128 = vrsqrt.f32 %v2081_v12  ;;  %vm2090_vm5 = vmor %vm2088_vm4, %vm2089_vm3  ;;  %vm2098_vm7 = vweird.f32 %v2081_v12 }
 0xad8   : > { %v2084_v14 = vmul.f32 %v3127_v11, %v2083_v13 }
 0xada   : > { %v2085_v16 = vmul.f32 0.5, %v2084_v14 }
 0xadc   : > { %v2086_v45 = vsub.f32 1.5, %v2085_v16 }
 0xadd   : > { %v3129_v18 = vpop.eup %3128 }
 0xade   : > { %v2087_v19 = vmul.f32 %v3127_v11, %v2086_v45  ;;  %v2093_v15 = vmul.f32 %v3129_v18, %v2081_v12  ;;  %vm2099_vm6 = vweird.f32 %v3129_v18 }
 0xadf   : > { %vm2100_vm10 = vmor %vm2098_vm7, %vm2099_vm6 }
 0xae0   : > { %v2091_v20 = vsel %vm2090_vm5, %v3127_v11, %v2087_v19  ;;  %v2094_v21 = vmul.f32 %v3129_v18, %v2093_v15 }
 0xae1   : > { %v2102_v39 = vmul.f32 %v2091_v20, %v2070_v4 }
 0xae2   : > { %v2095_v22 = vmul.f32 0.5, %v2094_v21 }
 0xae3   : > { %v2105_v55 = vmul.f32 %v2104_v25, %v2102_v39 }
 0xae4   : > { %v2096_v24 = vsub.f32 1.5, %v2095_v22 }
 0xae5   : > { %v2108_v26 = vadd.f32 %v2107_v40, %v2105_v55 }
 0xae6   : > { %v2097_v27 = vmul.f32 %v3129_v18, %v2096_v24 }
 0xae7   : > { %2110 = vst [vmem:[#allocation2] sm:$0xff] %v2108_v26 }
 0xae8   : > { %v2101_v28 = vsel %vm2100_vm10, %v3129_v18, %v2097_v27 }
 0xae9   : > { %v2103_v29 = vmul.f32 %v2101_v28, %v2071_v7 }
 0xaeb   : > { %v2106_v30 = vmul.f32 %v2104_v25, %v2103_v29  ;;  %2115 = sbr.rel (%p2804_p1) target bundleno = 3109 (0xc25), region = 104 }
 0xaed   : > { %v2109_v17 = vadd.f32 %v2107_v40, %v2106_v30 }
 0xaef   : > { %2111 = vst [vmem:[#allocation2 + $0x8] sm:$0xff] %v2109_v17 }
 0xaf0   : > { %v2951_v32 = vld [vmem:[#allocation11 + $0x38] sm:$0xff]  ;;  %v2950_v33 = vld [vmem:[#allocation11 + $0x30] sm:$0xff]  ;;  %v2949_v38 = vld [vmem:[#allocation11 + $0x28] sm:$0xff]  ;;  %v2116_v31 = vpack.c.bf16 %v2109_v17, %v2108_v26  ;;  %v2133_v54 = vperm.slane %v3665_v0, 2  ;;  %v2215_v60 = vperm.slane %v3665_v0, 3 }
 0xaf1   : > { %2182 = vmatpush.bf16.msra.mxu0 %v2951_v32  ;;  %v2959_v34 = vld [vmem:[#allocation13 + $0x38] sm:$0xff]  ;;  %v2958_v36 = vld [vmem:[#allocation13 + $0x30] sm:$0xff]  ;;  %v2957_v41 = vld [vmem:[#allocation13 + $0x28] sm:$0xff] }
 0xaf2   : > { %2264 = vmatpush.bf16.msra.mxu1 %v2959_v34  ;;  %v2948_v44 = vld [vmem:[#allocation11 + $0x20] sm:$0xff]  ;;  %v2947_v47 = vld [vmem:[#allocation11 + $0x18] sm:$0xff]  ;;  %v2946_v6 = vld [vmem:[#allocation11 + $0x10] sm:$0xff] }
 0xaf3   : > { %v2956_v46 = vld [vmem:[#allocation13 + $0x20] sm:$0xff]  ;;  %v2945_v48 = vld [vmem:[#allocation11 + $0x8] sm:$0xff]  ;;  %v2955_v49 = vld [vmem:[#allocation13 + $0x18] sm:$0xff] }
 0xaf4   : > { %v2944_v23 = vld [vmem:[#allocation11] sm:$0xff]  ;;  %v2954_v50 = vld [vmem:[#allocation13 + $0x10] sm:$0xff]  ;;  %v2953_v51 = vld [vmem:[#allocation13 + $0x8] sm:$0xff] }
 0xaf5   : > { %2183 = vmatpush.bf16.msra.mxu0 %v2950_v33  ;;  %v2952_v52 = vld [vmem:[#allocation13] sm:$0xff] }
 0xaf6   : > { %2265 = vmatpush.bf16.msra.mxu1 %v2958_v36 }
 0xaf9   : > { %2184 = vmatpush.bf16.msra.mxu0 %v2949_v38 }
 0xafa   : > { %2266 = vmatpush.bf16.msra.mxu1 %v2957_v41 }
 0xafd   : > { %2185 = vmatpush.bf16.msra.mxu0 %v2948_v44 }
 0xafe   : > { %2267 = vmatpush.bf16.msra.mxu1 %v2956_v46 }
 0xb01   : > { %2186 = vmatpush.bf16.msra.mxu0 %v2947_v47 }
 0xb02   : > { %2268 = vmatpush.bf16.msra.mxu1 %v2955_v49 }
 0xb05   : > { %2187 = vmatpush.bf16.msra.mxu0 %v2946_v6 }
 0xb06   : > { %2269 = vmatpush.bf16.msra.mxu1 %v2954_v50 }
 0xb09   : > { %2188 = vmatpush.bf16.msra.mxu0 %v2945_v48 }
 0xb0a   : > { %2270 = vmatpush.bf16.msra.mxu1 %v2953_v51 }
 0xb0d   : > { %2189 = vmatpush.bf16.msra.mxu0 %v2944_v23 }
 0xb0e   : > { %2271 = vmatpush.bf16.msra.mxu1 %v2952_v52 }
 0xb10   : > { %2190 = vmatmul.bf16.vlgmr.msra.gmra.mxu0 %v2116_v31 }
 0xb8d   : > { %v2191_v53 = vpop.f32.mrf.mxu0 }
 0xb8e   : > { %v2192_v56 = vadd.f32 %v2191_v53, %v2133_v54 }
 0xb90   : > { %v2196_v35 = vmax.f32 %v2192_v56, 0.0 }
 0xb95   : > { %v2193_v57 = vpop.f32.mrf.mxu0 }
 0xb96   : > { %v2194_v43 = vadd.f32 %v2193_v57, %v2133_v54 }
 0xb98   : > { %v2197_v58 = vmax.f32 %v2194_v43, 0.0 }
 0xb9a   : > { %v2198_v59 = vpack.c.bf16 %v2197_v58, %v2196_v35 }
 0xb9c   : > { %2272 = vmatmul.bf16.vlgmr.msra.gmra.mxu1 %v2198_v59 }
 0xc19   : > { %v2273_v62 = vpop.f32.mrf.mxu1 }
 0xc1a   : > { %v2274_v1 = vadd.f32 %v2273_v62, %v2215_v60 }
 0xc1c   : > { %2278 = vst [vmem:[%s4039_s14] sm:$0xff] %v2274_v1 }
 0xc21   : > { %v2275_v2 = vpop.f32.mrf.mxu1 }
 0xc22   : > { %v2276_v4 = vadd.f32 %v2275_v2, %v2215_v60 }
 0xc24   : > { %2279 = vst [vmem:[%s4039_s14 + $0x8] sm:$0xff] %v2276_v4 }
 0xc25 PF: > { %s30_s26 = sadd.s32 1, %s3404_s26   ;;  %s4040_s15 = sld [smem:[#allocation18_spill]] }
 0xc26   : > { %p27_p4 = scmp.ge.s32.totalorder %s30_s26, 4   ;;  %s4041_s23 = sld [smem:[#allocation22_spill]] }
 0xc27   : > { %s4042_s4 = sld [smem:[#allocation21_spill]]  ;;  %s4043_s21 = smov %s3388_s22 }
 0xc28   : > { %s4045_s24 = smov %s3400_s25 }
 0xc29   :  { %29 = sbr.rel (!%p27_p4) target bundleno = 18 (0x12), region = 173 }
 0xc2b   : > { %s4044_s22 = smov %s4040_s15 }
 0xc2d   : > { %s4046_s25 = smov %s4042_s4 }
 0xc2e   :  { %2301 = vsyncpa [#allocation4], 1 }
 0xc2f   :  { %2303 = vsyncpa [#allocation4 + $0x1], 1 }
 0xc30   :  { %2304 = vsyncpa [#allocation6], 1 }
 0xc31   :  { %2306 = vsyncpa [#allocation6 + $0x1], 1 }
 0xc32   :  { %2307 = vsyncpa [#allocation9], 1 }
 0xc33   :  { %2309 = vsyncpa [#allocation9 + $0x1], 1 }
 0xc34   :  { %2310 = vsyncpa [#allocation12], 1 }

</bundles_post_ra>
